<compile_context>
chip_gen: v6e
topology: v6e:2x2x1
jax: 0.10.0
libtpu: 0.0.40
codegen_flags: <defaults>
</compile_context>

<pallas_src>
import numpy as np
import jax
import jax.numpy as jnp
from jax.experimental import pallas as pl
from jax.experimental.pallas import tpu as pltpu


class Config:
    batch_size = 2
    features = 8        # sequence length after .view(B, -1, 1)
    d_model = 32
    heads = 4
    mlp_size = 64
    layers = 2
    dropout_rate = 0.0  # dropout is the identity in this forward pass


VEC_ROWS_PER_LAYER = 6   # g1, b1, g2, b2, bb1, bb2
VEC_ROWS = ((VEC_ROWS_PER_LAYER * Config.layers + 2 + 7) // 8) * 8   # sublane-aligned
VEC_LANES = 128          # lane-aligned packing width (>= mlp_size)


def _layernorm_ref(x, gamma, beta, eps=1e-5):
    """Two-pass LayerNorm (mirror of nn.LayerNorm) — used by the pure-JAX reference."""
    mu = jnp.mean(x, axis=-1, keepdims=True)
    var = jnp.mean((x - mu) ** 2, axis=-1, keepdims=True)
    return (x - mu) * jax.lax.rsqrt(var + eps) * gamma + beta


def _layernorm_fused(x, gamma, beta, eps=1e-5):
    """Single-pass LayerNorm: the two cross-lane reduces are independent and can
    overlap in the XLU pipeline (shorter dependency chain in a latency-bound kernel)."""
    inv_d = 1.0 / x.shape[-1]
    s1 = jnp.sum(x, axis=-1, keepdims=True)
    s2 = jnp.sum(x * x, axis=-1, keepdims=True)
    mu = s1 * inv_d
    var = s2 * inv_d - mu * mu
    return (x - mu) * jax.lax.rsqrt(var + eps) * gamma + beta


def encoder_kernel(x_ref, emb_ref, vec_ref, w_ref, o_ref):
    B, F, D = Config.batch_size, Config.features, Config.d_model
    H, M, L = Config.heads, Config.mlp_size, Config.layers
    dk = D // H
    inv_sqrt_dk = 1.0 / float(np.sqrt(dk))

    xcol = x_ref[...]                  # (B*F, 1)
    ew = emb_ref[0]                    # (B*F, D) = emb_w * sqrt(D)
    eb = emb_ref[1]                    # (B*F, D) = emb_b * sqrt(D) + pe
    vecs = vec_ref[...]                # (VEC_ROWS, 128) packed LN/bias vectors

    # Embedding + positional encoding (scale & pe pre-folded into ew/eb).
    x = xcol * ew + eb                 # (B*F, D)

    for l in range(L):                 # static unroll over layers
        r = VEC_ROWS_PER_LAYER * l
        g1 = vecs[r + 0:r + 1, :D]
        b1 = vecs[r + 1:r + 2, :D]
        g2 = vecs[r + 2:r + 3, :D]
        b2 = vecs[r + 3:r + 4, :D]
        bb1 = vecs[r + 4:r + 5, :M]
        bb2 = vecs[r + 5:r + 6, :D]
        w1 = w_ref[2 * l][:D, :]       # (D, M)
        w2 = w_ref[2 * l + 1][:, :D]   # (M, D)

        # ---- self-attention sublayer (q = k = v = LN(x); no projections) ----
        x1 = _layernorm_fused(x, g1, b1)
        # Batch all (batch, head) blocks into one (B*H, F, dk) tensor; two batched
        # einsums replace the per-head loop of tiny dots.
        q = jnp.stack(
            [x1[b * F:(b + 1) * F, h * dk:(h + 1) * dk]
             for b in range(B) for h in range(H)], axis=0)           # (B*H, F, dk)
        s = jnp.einsum("nqd,nkd->nqk", q, q,
                       preferred_element_type=jnp.float32) * inv_sqrt_dk
        s_max = jnp.max(s, axis=-1, keepdims=True)
        e = jnp.exp(s - s_max)
        p = e / jnp.sum(e, axis=-1, keepdims=True)                   # softmax (dropout p=0)
        o = jnp.einsum("nqk,nkd->nqd", p, q,
                       preferred_element_type=jnp.float32)           # (B*H, F, dk)
        attn = jnp.concatenate(
            [jnp.concatenate([o[b * H + h] for h in range(H)], axis=-1)
             for b in range(B)], axis=0)                             # (B*F, D)
        x = x + attn

        # ---- feed-forward sublayer (residual adds to LN(x), faithful to module) ----
        x = _layernorm_fused(x, g2, b2)
        h1 = jnp.maximum(jnp.dot(x, w1, preferred_element_type=jnp.float32) + bb1, 0.0)
        ff = jnp.dot(h1, w2, preferred_element_type=jnp.float32) + bb2
        x = x + ff

    # final LayerNorm
    rf = VEC_ROWS_PER_LAYER * L
    gf = vecs[rf + 0:rf + 1, :D]
    bf = vecs[rf + 1:rf + 2, :D]
    o_ref[...] = _layernorm_fused(x, gf, bf)


def pack_params(params):
    """One-time parameter preprocessing (constant folding on parameters):
    - fold sqrt(d_model) and the positional encoding into the embedding weights/bias
    - pack all tiny LN/bias vectors into one lane-aligned (VEC_ROWS, 128) slab
    - pack the FF weights into one (2L, M, M) slab
    The kernel then takes 4 operands instead of 14."""
    B, F, D = Config.batch_size, Config.features, Config.d_model
    M, L = Config.mlp_size, Config.layers
    sqrt_d = float(np.sqrt(D))

    ew = (params["emb_w"] * sqrt_d).reshape(B * F, D)
    eb = (params["emb_b"] * sqrt_d + params["pe"]).reshape(B * F, D)   # pe is (B,1,D)
    emb = jnp.stack([ew, eb], axis=0)                                  # (2, B*F, D)

    vecs = jnp.zeros((VEC_ROWS, VEC_LANES), jnp.float32)
    for l in range(L):
        r = VEC_ROWS_PER_LAYER * l
        vecs = vecs.at[r + 0, :D].set(params["g1"][l, 0])
        vecs = vecs.at[r + 1, :D].set(params["b1"][l, 0])
        vecs = vecs.at[r + 2, :D].set(params["g2"][l, 0])
        vecs = vecs.at[r + 3, :D].set(params["b2"][l, 0])
        vecs = vecs.at[r + 4, :M].set(params["bb1"][l, 0])
        vecs = vecs.at[r + 5, :D].set(params["bb2"][l, 0])
    rf = VEC_ROWS_PER_LAYER * L
    vecs = vecs.at[rf + 0, :D].set(params["gf"][0])
    vecs = vecs.at[rf + 1, :D].set(params["bf"][0])

    wslab = jnp.zeros((2 * L, M, M), jnp.float32)
    for l in range(L):
        wslab = wslab.at[2 * l, :D, :].set(params["w1"][l])        # (D, M)
        wslab = wslab.at[2 * l + 1, :, :D].set(params["w2"][l])    # (M, D)

    return {"emb": emb, "vecs": vecs, "wslab": wslab}


def encoder_forward(x, packed):
    B, F, D = Config.batch_size, Config.features, Config.d_model
    BF = B * F
    x2 = x.reshape(BF, 1).astype(jnp.float32)

    vmem = pl.BlockSpec(memory_space=pltpu.MemorySpace.VMEM)   # whole array in VMEM
    out = pl.pallas_call(
        encoder_kernel,
        out_shape=jax.ShapeDtypeStruct((BF, D), jnp.float32),
        in_specs=[vmem, vmem, vmem, vmem],
        out_specs=vmem,
    )(x2, packed["emb"], packed["vecs"], packed["wslab"])
    return out.reshape(B, F, D)


def reference_forward(x, params):
    """Pure-JAX mirror of the PyTorch Encoder.forward (for validation)."""
    B, F, D = Config.batch_size, Config.features, Config.d_model
    H, L = Config.heads, Config.layers
    dk = D // H

    h = x.reshape(B, F, 1) * params["emb_w"] + params["emb_b"]
    h = h * np.sqrt(D) + params["pe"]                       # (B,1,D) broadcast
    for l in range(L):
        x1 = _layernorm_ref(h, params["g1"][l, 0], params["b1"][l, 0])
        q = x1.reshape(B, F, H, dk).transpose(0, 2, 1, 3)   # (B,H,F,dk)
        s = jnp.einsum("bhqd,bhkd->bhqk", q, q) / np.sqrt(dk)
        p = jax.nn.softmax(s, axis=-1)
        attn = jnp.einsum("bhqk,bhkd->bhqd", p, q)
        attn = attn.transpose(0, 2, 1, 3).reshape(B, F, D)
        h = h + attn
        h = _layernorm_ref(h, params["g2"][l, 0], params["b2"][l, 0])
        ff = jnp.maximum(h @ params["w1"][l] + params["bb1"][l, 0], 0.0)
        ff = ff @ params["w2"][l] + params["bb2"][l, 0]
        h = h + ff
    return _layernorm_ref(h, params["gf"][0], params["bf"][0])


def make_positional_encoding():
    """Matches PositionalEncoding.__init__/forward of the reference module."""
    B, F, D = Config.batch_size, Config.features, Config.d_model
    pe = np.zeros((1000, D), dtype=np.float32)
    position = np.arange(0, 1000, dtype=np.float32)[:, None]
    div_term = np.exp(np.arange(0, D, 2, dtype=np.float32) * (-np.log(10000.0) / D))
    pe[:, 0::2] = np.sin(position * div_term)
    pe[:, 1::2] = np.cos(position * div_term)
    pe = pe[None].transpose(1, 0, 2)        # (1000, 1, D)
    pe = pe[:, :F, :]                       # dim 1 has size 1 -> stays (1000, 1, D)
    return jnp.asarray(pe[:B])              # p = pe[:x.size(0)] -> (B, 1, D)


def init_params(key):
    B, F, D = Config.batch_size, Config.features, Config.d_model
    M, L = Config.mlp_size, Config.layers
    ks = jax.random.split(key, 12)
    params = {
        "emb_w": jax.random.normal(ks[0], (B, F, D), jnp.float32),
        "emb_b": jax.random.normal(ks[1], (B, F, D), jnp.float32),
        "pe": make_positional_encoding(),
        # LayerNorm affine params (near-default init, deterministic)
        "g1": 1.0 + 0.05 * jax.random.normal(ks[2], (L, 1, D), jnp.float32),
        "b1": 0.05 * jax.random.normal(ks[3], (L, 1, D), jnp.float32),
        "g2": 1.0 + 0.05 * jax.random.normal(ks[4], (L, 1, D), jnp.float32),
        "b2": 0.05 * jax.random.normal(ks[5], (L, 1, D), jnp.float32),
        # FF linear weights stored as (in, out): y = x @ W + b
        "w1": 0.1 * jax.random.normal(ks[6], (L, D, M), jnp.float32),
        "bb1": 0.1 * jax.random.normal(ks[7], (L, 1, M), jnp.float32),
        "w2": 0.1 * jax.random.normal(ks[8], (L, M, D), jnp.float32),
        "bb2": 0.1 * jax.random.normal(ks[9], (L, 1, D), jnp.float32),
        "gf": 1.0 + 0.05 * jax.random.normal(ks[10], (1, D), jnp.float32),
        "bf": 0.05 * jax.random.normal(ks[11], (1, D), jnp.float32),
    }
    return params


if __name__ == "__main__":
    key = jax.random.PRNGKey(0)
    k_x, k_p = jax.random.split(key)
    x = jax.random.normal(k_x, (Config.batch_size, Config.features), jnp.float32)
    params = init_params(k_p)
    packed = pack_params(params)          # one-time parameter folding/packing

    out = encoder_forward(x, packed)
    out = jax.block_until_ready(out)

    ref = reference_forward(x, params)
    assert out.shape == (Config.batch_size, Config.features, Config.d_model)
    np.testing.assert_allclose(np.asarray(out), np.asarray(ref), rtol=1e-4, atol=1e-4)

    print("KERNEL_OK")
</pallas_src>

<mosaic_0001>
module attributes {stable_mosaic.version = 11 : i64} {
  func.func @encoder_kernel(%arg0: memref<16x1xf32, #tpu.memory_space<vmem>>, %arg1: memref<2x16x32xf32, #tpu.memory_space<vmem>>, %arg2: memref<16x128xf32, #tpu.memory_space<vmem>>, %arg3: memref<4x64x64xf32, #tpu.memory_space<vmem>>, %arg4: memref<16x32xf32, #tpu.memory_space<vmem>>) attributes {dimension_semantics = [], scalar_prefetch = 0 : i64, scratch_operands = 0 : i64, tpu.core_type = #tpu.core_type<tc>} {
    %c0 = arith.constant 0 : index
    %c0_0 = arith.constant 0 : index
    %0 = vector.load %arg0[%c0, %c0_0] : memref<16x1xf32, #tpu.memory_space<vmem>>, vector<16x1xf32>
    %c0_1 = arith.constant 0 : index
    %c0_2 = arith.constant 0 : index
    %c0_3 = arith.constant 0 : index
    %1 = vector.load %arg1[%c0_1, %c0_2, %c0_3] : memref<2x16x32xf32, #tpu.memory_space<vmem>>, vector<1x16x32xf32>
    %2 = vector.shape_cast %1 : vector<1x16x32xf32> to vector<16x32xf32>
    %c1 = arith.constant 1 : index
    %c0_4 = arith.constant 0 : index
    %c0_5 = arith.constant 0 : index
    %3 = vector.load %arg1[%c1, %c0_4, %c0_5] : memref<2x16x32xf32, #tpu.memory_space<vmem>>, vector<1x16x32xf32>
    %4 = vector.shape_cast %3 : vector<1x16x32xf32> to vector<16x32xf32>
    %c0_6 = arith.constant 0 : index
    %c0_7 = arith.constant 0 : index
    %5 = vector.load %arg2[%c0_6, %c0_7] : memref<16x128xf32, #tpu.memory_space<vmem>>, vector<16x128xf32>
    %6 = vector.broadcast %0 : vector<16x1xf32> to vector<16x32xf32>
    %7 = arith.mulf %6, %2 : vector<16x32xf32>
    %8 = arith.addf %7, %4 : vector<16x32xf32>
    %9 = vector.extract_strided_slice %5 {offsets = [0, 0], sizes = [1, 32], strides = [1, 1]} : vector<16x128xf32> to vector<1x32xf32>
    %10 = vector.extract_strided_slice %5 {offsets = [1, 0], sizes = [1, 32], strides = [1, 1]} : vector<16x128xf32> to vector<1x32xf32>
    %11 = vector.extract_strided_slice %5 {offsets = [2, 0], sizes = [1, 32], strides = [1, 1]} : vector<16x128xf32> to vector<1x32xf32>
    %12 = vector.extract_strided_slice %5 {offsets = [3, 0], sizes = [1, 32], strides = [1, 1]} : vector<16x128xf32> to vector<1x32xf32>
    %13 = vector.extract_strided_slice %5 {offsets = [4, 0], sizes = [1, 64], strides = [1, 1]} : vector<16x128xf32> to vector<1x64xf32>
    %14 = vector.extract_strided_slice %5 {offsets = [5, 0], sizes = [1, 32], strides = [1, 1]} : vector<16x128xf32> to vector<1x32xf32>
    %c0_8 = arith.constant 0 : index
    %c0_9 = arith.constant 0 : index
    %c0_10 = arith.constant 0 : index
    %15 = vector.load %arg3[%c0_8, %c0_9, %c0_10] : memref<4x64x64xf32, #tpu.memory_space<vmem>>, vector<1x64x64xf32>
    %16 = vector.shape_cast %15 : vector<1x64x64xf32> to vector<64x64xf32>
    %17 = vector.extract_strided_slice %16 {offsets = [0, 0], sizes = [32, 64], strides = [1, 1]} : vector<64x64xf32> to vector<32x64xf32>
    %c1_11 = arith.constant 1 : index
    %c0_12 = arith.constant 0 : index
    %c0_13 = arith.constant 0 : index
    %18 = vector.load %arg3[%c1_11, %c0_12, %c0_13] : memref<4x64x64xf32, #tpu.memory_space<vmem>>, vector<1x64x64xf32>
    %19 = vector.shape_cast %18 : vector<1x64x64xf32> to vector<64x64xf32>
    %20 = vector.extract_strided_slice %19 {offsets = [0, 0], sizes = [64, 32], strides = [1, 1]} : vector<64x64xf32> to vector<64x32xf32>
    %cst = arith.constant dense<0.000000e+00> : vector<16xf32>
    %21 = vector.multi_reduction <add>, %8, %cst [1] : vector<16x32xf32> to vector<16xf32>
    %22 = vector.shape_cast %21 : vector<16xf32> to vector<16x1xf32>
    %23 = arith.mulf %8, %8 : vector<16x32xf32>
    %cst_14 = arith.constant dense<0.000000e+00> : vector<16xf32>
    %24 = vector.multi_reduction <add>, %23, %cst_14 [1] : vector<16x32xf32> to vector<16xf32>
    %25 = vector.shape_cast %24 : vector<16xf32> to vector<16x1xf32>
    %cst_15 = arith.constant 3.125000e-02 : f32
    %26 = vector.broadcast %cst_15 : f32 to vector<16x1xf32>
    %27 = arith.mulf %22, %26 : vector<16x1xf32>
    %cst_16 = arith.constant 3.125000e-02 : f32
    %28 = vector.broadcast %cst_16 : f32 to vector<16x1xf32>
    %29 = arith.mulf %25, %28 : vector<16x1xf32>
    %30 = arith.mulf %27, %27 : vector<16x1xf32>
    %31 = arith.subf %29, %30 : vector<16x1xf32>
    %32 = vector.broadcast %27 : vector<16x1xf32> to vector<16x32xf32>
    %33 = arith.subf %8, %32 : vector<16x32xf32>
    %cst_17 = arith.constant 9.99999974E-6 : f32
    %34 = vector.broadcast %cst_17 : f32 to vector<16x1xf32>
    %35 = arith.addf %31, %34 : vector<16x1xf32>
    %36 = math.rsqrt %35 : vector<16x1xf32>
    %37 = vector.broadcast %36 : vector<16x1xf32> to vector<16x32xf32>
    %38 = arith.mulf %33, %37 : vector<16x32xf32>
    %39 = vector.broadcast %9 : vector<1x32xf32> to vector<16x32xf32>
    %40 = arith.mulf %38, %39 : vector<16x32xf32>
    %41 = vector.broadcast %10 : vector<1x32xf32> to vector<16x32xf32>
    %42 = arith.addf %40, %41 : vector<16x32xf32>
    %43 = vector.extract_strided_slice %42 {offsets = [0, 0], sizes = [8, 8], strides = [1, 1]} : vector<16x32xf32> to vector<8x8xf32>
    %44 = vector.extract_strided_slice %42 {offsets = [0, 8], sizes = [8, 8], strides = [1, 1]} : vector<16x32xf32> to vector<8x8xf32>
    %45 = vector.extract_strided_slice %42 {offsets = [0, 16], sizes = [8, 8], strides = [1, 1]} : vector<16x32xf32> to vector<8x8xf32>
    %46 = vector.extract_strided_slice %42 {offsets = [0, 24], sizes = [8, 8], strides = [1, 1]} : vector<16x32xf32> to vector<8x8xf32>
    %47 = vector.extract_strided_slice %42 {offsets = [8, 0], sizes = [8, 8], strides = [1, 1]} : vector<16x32xf32> to vector<8x8xf32>
    %48 = vector.extract_strided_slice %42 {offsets = [8, 8], sizes = [8, 8], strides = [1, 1]} : vector<16x32xf32> to vector<8x8xf32>
    %49 = vector.extract_strided_slice %42 {offsets = [8, 16], sizes = [8, 8], strides = [1, 1]} : vector<16x32xf32> to vector<8x8xf32>
    %50 = vector.extract_strided_slice %42 {offsets = [8, 24], sizes = [8, 8], strides = [1, 1]} : vector<16x32xf32> to vector<8x8xf32>
    %51 = vector.shape_cast %43 : vector<8x8xf32> to vector<1x8x8xf32>
    %52 = vector.shape_cast %44 : vector<8x8xf32> to vector<1x8x8xf32>
    %53 = vector.shape_cast %45 : vector<8x8xf32> to vector<1x8x8xf32>
    %54 = vector.shape_cast %46 : vector<8x8xf32> to vector<1x8x8xf32>
    %55 = vector.shape_cast %47 : vector<8x8xf32> to vector<1x8x8xf32>
    %56 = vector.shape_cast %48 : vector<8x8xf32> to vector<1x8x8xf32>
    %57 = vector.shape_cast %49 : vector<8x8xf32> to vector<1x8x8xf32>
    %58 = vector.shape_cast %50 : vector<8x8xf32> to vector<1x8x8xf32>
    %59 = tpu.concatenate %51, %52, %53, %54, %55, %56, %57, %58 in 0 : vector<1x8x8xf32>, vector<1x8x8xf32>, vector<1x8x8xf32>, vector<1x8x8xf32>, vector<1x8x8xf32>, vector<1x8x8xf32>, vector<1x8x8xf32>, vector<1x8x8xf32> -> vector<8x8x8xf32>
    "tpu.trace_start"() <{level = 10 : i32, message = "nqd,nkd->nqk"}> : () -> ()
    %cst_18 = arith.constant dense<0.000000e+00> : vector<8x8x8xf32>
    %60 = tpu.matmul %59, %59, %cst_18 {dimension_numbers = #tpu.dot_dimension_numbers<[2], [2], [1], [1], [0, 0, 0, 1, 1, 1], [0], [0]>} : vector<8x8x8xf32>, vector<8x8x8xf32>, vector<8x8x8xf32> -> vector<8x8x8xf32>
    "tpu.trace_stop"() : () -> ()
    %cst_19 = arith.constant 0.353553385 : f32
    %61 = vector.broadcast %cst_19 : f32 to vector<8x8x8xf32>
    %62 = arith.mulf %60, %61 : vector<8x8x8xf32>
    %cst_20 = arith.constant dense<0xFF800000> : vector<8x8xf32>
    %63 = vector.multi_reduction <maximumf>, %62, %cst_20 [2] : vector<8x8x8xf32> to vector<8x8xf32>
    %64 = vector.shape_cast %63 : vector<8x8xf32> to vector<8x8x1xf32>
    %65 = vector.broadcast %64 : vector<8x8x1xf32> to vector<8x8x8xf32>
    %66 = arith.subf %62, %65 : vector<8x8x8xf32>
    %67 = math.exp %66 : vector<8x8x8xf32>
    %cst_21 = arith.constant dense<0.000000e+00> : vector<8x8xf32>
    %68 = vector.multi_reduction <add>, %67, %cst_21 [2] : vector<8x8x8xf32> to vector<8x8xf32>
    %69 = vector.shape_cast %68 : vector<8x8xf32> to vector<8x8x1xf32>
    %70 = vector.broadcast %69 : vector<8x8x1xf32> to vector<8x8x8xf32>
    %71 = arith.divf %67, %70 : vector<8x8x8xf32>
    "tpu.trace_start"() <{level = 10 : i32, message = "nqk,nkd->nqd"}> : () -> ()
    %cst_22 = arith.constant dense<0.000000e+00> : vector<8x8x8xf32>
    %72 = tpu.matmul %71, %59, %cst_22 {dimension_numbers = #tpu.dot_dimension_numbers<[2], [1], [1], [2], [0, 0, 0, 1, 1, 2], [0], [0]>} : vector<8x8x8xf32>, vector<8x8x8xf32>, vector<8x8x8xf32> -> vector<8x8x8xf32>
    "tpu.trace_stop"() : () -> ()
    %73 = vector.extract_strided_slice %72 {offsets = [0, 0, 0], sizes = [1, 8, 8], strides = [1, 1, 1]} : vector<8x8x8xf32> to vector<1x8x8xf32>
    %74 = vector.shape_cast %73 : vector<1x8x8xf32> to vector<8x8xf32>
    %75 = vector.extract_strided_slice %72 {offsets = [1, 0, 0], sizes = [1, 8, 8], strides = [1, 1, 1]} : vector<8x8x8xf32> to vector<1x8x8xf32>
    %76 = vector.shape_cast %75 : vector<1x8x8xf32> to vector<8x8xf32>
    %77 = vector.extract_strided_slice %72 {offsets = [2, 0, 0], sizes = [1, 8, 8], strides = [1, 1, 1]} : vector<8x8x8xf32> to vector<1x8x8xf32>
    %78 = vector.shape_cast %77 : vector<1x8x8xf32> to vector<8x8xf32>
    %79 = vector.extract_strided_slice %72 {offsets = [3, 0, 0], sizes = [1, 8, 8], strides = [1, 1, 1]} : vector<8x8x8xf32> to vector<1x8x8xf32>
    %80 = vector.shape_cast %79 : vector<1x8x8xf32> to vector<8x8xf32>
    %81 = tpu.concatenate %74, %76, %78, %80 in 1 : vector<8x8xf32>, vector<8x8xf32>, vector<8x8xf32>, vector<8x8xf32> -> vector<8x32xf32>
    %82 = vector.extract_strided_slice %72 {offsets = [4, 0, 0], sizes = [1, 8, 8], strides = [1, 1, 1]} : vector<8x8x8xf32> to vector<1x8x8xf32>
    %83 = vector.shape_cast %82 : vector<1x8x8xf32> to vector<8x8xf32>
    %84 = vector.extract_strided_slice %72 {offsets = [5, 0, 0], sizes = [1, 8, 8], strides = [1, 1, 1]} : vector<8x8x8xf32> to vector<1x8x8xf32>
    %85 = vector.shape_cast %84 : vector<1x8x8xf32> to vector<8x8xf32>
    %86 = vector.extract_strided_slice %72 {offsets = [6, 0, 0], sizes = [1, 8, 8], strides = [1, 1, 1]} : vector<8x8x8xf32> to vector<1x8x8xf32>
    %87 = vector.shape_cast %86 : vector<1x8x8xf32> to vector<8x8xf32>
    %88 = vector.extract_strided_slice %72 {offsets = [7, 0, 0], sizes = [1, 8, 8], strides = [1, 1, 1]} : vector<8x8x8xf32> to vector<1x8x8xf32>
    %89 = vector.shape_cast %88 : vector<1x8x8xf32> to vector<8x8xf32>
    %90 = tpu.concatenate %83, %85, %87, %89 in 1 : vector<8x8xf32>, vector<8x8xf32>, vector<8x8xf32>, vector<8x8xf32> -> vector<8x32xf32>
    %91 = tpu.concatenate %81, %90 in 0 : vector<8x32xf32>, vector<8x32xf32> -> vector<16x32xf32>
    %92 = arith.addf %8, %91 : vector<16x32xf32>
    %cst_23 = arith.constant dense<0.000000e+00> : vector<16xf32>
    %93 = vector.multi_reduction <add>, %92, %cst_23 [1] : vector<16x32xf32> to vector<16xf32>
    %94 = vector.shape_cast %93 : vector<16xf32> to vector<16x1xf32>
    %95 = arith.mulf %92, %92 : vector<16x32xf32>
    %cst_24 = arith.constant dense<0.000000e+00> : vector<16xf32>
    %96 = vector.multi_reduction <add>, %95, %cst_24 [1] : vector<16x32xf32> to vector<16xf32>
    %97 = vector.shape_cast %96 : vector<16xf32> to vector<16x1xf32>
    %cst_25 = arith.constant 3.125000e-02 : f32
    %98 = vector.broadcast %cst_25 : f32 to vector<16x1xf32>
    %99 = arith.mulf %94, %98 : vector<16x1xf32>
    %cst_26 = arith.constant 3.125000e-02 : f32
    %100 = vector.broadcast %cst_26 : f32 to vector<16x1xf32>
    %101 = arith.mulf %97, %100 : vector<16x1xf32>
    %102 = arith.mulf %99, %99 : vector<16x1xf32>
    %103 = arith.subf %101, %102 : vector<16x1xf32>
    %104 = vector.broadcast %99 : vector<16x1xf32> to vector<16x32xf32>
    %105 = arith.subf %92, %104 : vector<16x32xf32>
    %cst_27 = arith.constant 9.99999974E-6 : f32
    %106 = vector.broadcast %cst_27 : f32 to vector<16x1xf32>
    %107 = arith.addf %103, %106 : vector<16x1xf32>
    %108 = math.rsqrt %107 : vector<16x1xf32>
    %109 = vector.broadcast %108 : vector<16x1xf32> to vector<16x32xf32>
    %110 = arith.mulf %105, %109 : vector<16x32xf32>
    %111 = vector.broadcast %11 : vector<1x32xf32> to vector<16x32xf32>
    %112 = arith.mulf %110, %111 : vector<16x32xf32>
    %113 = vector.broadcast %12 : vector<1x32xf32> to vector<16x32xf32>
    %114 = arith.addf %112, %113 : vector<16x32xf32>
    %cst_28 = arith.constant dense<0.000000e+00> : vector<16x64xf32>
    %115 = tpu.matmul %114, %17, %cst_28 {dimension_numbers = #tpu.dot_dimension_numbers<[1], [0], [0], [1], [0, 0, 1, 1], [], []>} : vector<16x32xf32>, vector<32x64xf32>, vector<16x64xf32> -> vector<16x64xf32>
    %116 = vector.broadcast %13 : vector<1x64xf32> to vector<16x64xf32>
    %117 = arith.addf %115, %116 : vector<16x64xf32>
    %cst_29 = arith.constant 0.000000e+00 : f32
    %118 = vector.broadcast %cst_29 : f32 to vector<16x64xf32>
    %119 = arith.maximumf %117, %118 : vector<16x64xf32>
    %cst_30 = arith.constant dense<0.000000e+00> : vector<16x32xf32>
    %120 = tpu.matmul %119, %20, %cst_30 {dimension_numbers = #tpu.dot_dimension_numbers<[1], [0], [0], [1], [0, 0, 1, 1], [], []>} : vector<16x64xf32>, vector<64x32xf32>, vector<16x32xf32> -> vector<16x32xf32>
    %121 = vector.broadcast %14 : vector<1x32xf32> to vector<16x32xf32>
    %122 = arith.addf %120, %121 : vector<16x32xf32>
    %123 = arith.addf %114, %122 : vector<16x32xf32>
    %124 = vector.extract_strided_slice %5 {offsets = [6, 0], sizes = [1, 32], strides = [1, 1]} : vector<16x128xf32> to vector<1x32xf32>
    %125 = vector.extract_strided_slice %5 {offsets = [7, 0], sizes = [1, 32], strides = [1, 1]} : vector<16x128xf32> to vector<1x32xf32>
    %126 = vector.extract_strided_slice %5 {offsets = [8, 0], sizes = [1, 32], strides = [1, 1]} : vector<16x128xf32> to vector<1x32xf32>
    %127 = vector.extract_strided_slice %5 {offsets = [9, 0], sizes = [1, 32], strides = [1, 1]} : vector<16x128xf32> to vector<1x32xf32>
    %128 = vector.extract_strided_slice %5 {offsets = [10, 0], sizes = [1, 64], strides = [1, 1]} : vector<16x128xf32> to vector<1x64xf32>
    %129 = vector.extract_strided_slice %5 {offsets = [11, 0], sizes = [1, 32], strides = [1, 1]} : vector<16x128xf32> to vector<1x32xf32>
    %c2 = arith.constant 2 : index
    %c0_31 = arith.constant 0 : index
    %c0_32 = arith.constant 0 : index
    %130 = vector.load %arg3[%c2, %c0_31, %c0_32] : memref<4x64x64xf32, #tpu.memory_space<vmem>>, vector<1x64x64xf32>
    %131 = vector.shape_cast %130 : vector<1x64x64xf32> to vector<64x64xf32>
    %132 = vector.extract_strided_slice %131 {offsets = [0, 0], sizes = [32, 64], strides = [1, 1]} : vector<64x64xf32> to vector<32x64xf32>
    %c3 = arith.constant 3 : index
    %c0_33 = arith.constant 0 : index
    %c0_34 = arith.constant 0 : index
    %133 = vector.load %arg3[%c3, %c0_33, %c0_34] : memref<4x64x64xf32, #tpu.memory_space<vmem>>, vector<1x64x64xf32>
    %134 = vector.shape_cast %133 : vector<1x64x64xf32> to vector<64x64xf32>
    %135 = vector.extract_strided_slice %134 {offsets = [0, 0], sizes = [64, 32], strides = [1, 1]} : vector<64x64xf32> to vector<64x32xf32>
    %cst_35 = arith.constant dense<0.000000e+00> : vector<16xf32>
    %136 = vector.multi_reduction <add>, %123, %cst_35 [1] : vector<16x32xf32> to vector<16xf32>
    %137 = vector.shape_cast %136 : vector<16xf32> to vector<16x1xf32>
    %138 = arith.mulf %123, %123 : vector<16x32xf32>
    %cst_36 = arith.constant dense<0.000000e+00> : vector<16xf32>
    %139 = vector.multi_reduction <add>, %138, %cst_36 [1] : vector<16x32xf32> to vector<16xf32>
    %140 = vector.shape_cast %139 : vector<16xf32> to vector<16x1xf32>
    %cst_37 = arith.constant 3.125000e-02 : f32
    %141 = vector.broadcast %cst_37 : f32 to vector<16x1xf32>
    %142 = arith.mulf %137, %141 : vector<16x1xf32>
    %cst_38 = arith.constant 3.125000e-02 : f32
    %143 = vector.broadcast %cst_38 : f32 to vector<16x1xf32>
    %144 = arith.mulf %140, %143 : vector<16x1xf32>
    %145 = arith.mulf %142, %142 : vector<16x1xf32>
    %146 = arith.subf %144, %145 : vector<16x1xf32>
    %147 = vector.broadcast %142 : vector<16x1xf32> to vector<16x32xf32>
    %148 = arith.subf %123, %147 : vector<16x32xf32>
    %cst_39 = arith.constant 9.99999974E-6 : f32
    %149 = vector.broadcast %cst_39 : f32 to vector<16x1xf32>
    %150 = arith.addf %146, %149 : vector<16x1xf32>
    %151 = math.rsqrt %150 : vector<16x1xf32>
    %152 = vector.broadcast %151 : vector<16x1xf32> to vector<16x32xf32>
    %153 = arith.mulf %148, %152 : vector<16x32xf32>
    %154 = vector.broadcast %124 : vector<1x32xf32> to vector<16x32xf32>
    %155 = arith.mulf %153, %154 : vector<16x32xf32>
    %156 = vector.broadcast %125 : vector<1x32xf32> to vector<16x32xf32>
    %157 = arith.addf %155, %156 : vector<16x32xf32>
    %158 = vector.extract_strided_slice %157 {offsets = [0, 0], sizes = [8, 8], strides = [1, 1]} : vector<16x32xf32> to vector<8x8xf32>
    %159 = vector.extract_strided_slice %157 {offsets = [0, 8], sizes = [8, 8], strides = [1, 1]} : vector<16x32xf32> to vector<8x8xf32>
    %160 = vector.extract_strided_slice %157 {offsets = [0, 16], sizes = [8, 8], strides = [1, 1]} : vector<16x32xf32> to vector<8x8xf32>
    %161 = vector.extract_strided_slice %157 {offsets = [0, 24], sizes = [8, 8], strides = [1, 1]} : vector<16x32xf32> to vector<8x8xf32>
    %162 = vector.extract_strided_slice %157 {offsets = [8, 0], sizes = [8, 8], strides = [1, 1]} : vector<16x32xf32> to vector<8x8xf32>
    %163 = vector.extract_strided_slice %157 {offsets = [8, 8], sizes = [8, 8], strides = [1, 1]} : vector<16x32xf32> to vector<8x8xf32>
    %164 = vector.extract_strided_slice %157 {offsets = [8, 16], sizes = [8, 8], strides = [1, 1]} : vector<16x32xf32> to vector<8x8xf32>
    %165 = vector.extract_strided_slice %157 {offsets = [8, 24], sizes = [8, 8], strides = [1, 1]} : vector<16x32xf32> to vector<8x8xf32>
    %166 = vector.shape_cast %158 : vector<8x8xf32> to vector<1x8x8xf32>
    %167 = vector.shape_cast %159 : vector<8x8xf32> to vector<1x8x8xf32>
    %168 = vector.shape_cast %160 : vector<8x8xf32> to vector<1x8x8xf32>
    %169 = vector.shape_cast %161 : vector<8x8xf32> to vector<1x8x8xf32>
    %170 = vector.shape_cast %162 : vector<8x8xf32> to vector<1x8x8xf32>
    %171 = vector.shape_cast %163 : vector<8x8xf32> to vector<1x8x8xf32>
    %172 = vector.shape_cast %164 : vector<8x8xf32> to vector<1x8x8xf32>
    %173 = vector.shape_cast %165 : vector<8x8xf32> to vector<1x8x8xf32>
    %174 = tpu.concatenate %166, %167, %168, %169, %170, %171, %172, %173 in 0 : vector<1x8x8xf32>, vector<1x8x8xf32>, vector<1x8x8xf32>, vector<1x8x8xf32>, vector<1x8x8xf32>, vector<1x8x8xf32>, vector<1x8x8xf32>, vector<1x8x8xf32> -> vector<8x8x8xf32>
    "tpu.trace_start"() <{level = 10 : i32, message = "nqd,nkd->nqk"}> : () -> ()
    %cst_40 = arith.constant dense<0.000000e+00> : vector<8x8x8xf32>
    %175 = tpu.matmul %174, %174, %cst_40 {dimension_numbers = #tpu.dot_dimension_numbers<[2], [2], [1], [1], [0, 0, 0, 1, 1, 1], [0], [0]>} : vector<8x8x8xf32>, vector<8x8x8xf32>, vector<8x8x8xf32> -> vector<8x8x8xf32>
    "tpu.trace_stop"() : () -> ()
    %cst_41 = arith.constant 0.353553385 : f32
    %176 = vector.broadcast %cst_41 : f32 to vector<8x8x8xf32>
    %177 = arith.mulf %175, %176 : vector<8x8x8xf32>
    %cst_42 = arith.constant dense<0xFF800000> : vector<8x8xf32>
    %178 = vector.multi_reduction <maximumf>, %177, %cst_42 [2] : vector<8x8x8xf32> to vector<8x8xf32>
    %179 = vector.shape_cast %178 : vector<8x8xf32> to vector<8x8x1xf32>
    %180 = vector.broadcast %179 : vector<8x8x1xf32> to vector<8x8x8xf32>
    %181 = arith.subf %177, %180 : vector<8x8x8xf32>
    %182 = math.exp %181 : vector<8x8x8xf32>
    %cst_43 = arith.constant dense<0.000000e+00> : vector<8x8xf32>
    %183 = vector.multi_reduction <add>, %182, %cst_43 [2] : vector<8x8x8xf32> to vector<8x8xf32>
    %184 = vector.shape_cast %183 : vector<8x8xf32> to vector<8x8x1xf32>
    %185 = vector.broadcast %184 : vector<8x8x1xf32> to vector<8x8x8xf32>
    %186 = arith.divf %182, %185 : vector<8x8x8xf32>
    "tpu.trace_start"() <{level = 10 : i32, message = "nqk,nkd->nqd"}> : () -> ()
    %cst_44 = arith.constant dense<0.000000e+00> : vector<8x8x8xf32>
    %187 = tpu.matmul %186, %174, %cst_44 {dimension_numbers = #tpu.dot_dimension_numbers<[2], [1], [1], [2], [0, 0, 0, 1, 1, 2], [0], [0]>} : vector<8x8x8xf32>, vector<8x8x8xf32>, vector<8x8x8xf32> -> vector<8x8x8xf32>
    "tpu.trace_stop"() : () -> ()
    %188 = vector.extract_strided_slice %187 {offsets = [0, 0, 0], sizes = [1, 8, 8], strides = [1, 1, 1]} : vector<8x8x8xf32> to vector<1x8x8xf32>
    %189 = vector.shape_cast %188 : vector<1x8x8xf32> to vector<8x8xf32>
    %190 = vector.extract_strided_slice %187 {offsets = [1, 0, 0], sizes = [1, 8, 8], strides = [1, 1, 1]} : vector<8x8x8xf32> to vector<1x8x8xf32>
    %191 = vector.shape_cast %190 : vector<1x8x8xf32> to vector<8x8xf32>
    %192 = vector.extract_strided_slice %187 {offsets = [2, 0, 0], sizes = [1, 8, 8], strides = [1, 1, 1]} : vector<8x8x8xf32> to vector<1x8x8xf32>
    %193 = vector.shape_cast %192 : vector<1x8x8xf32> to vector<8x8xf32>
    %194 = vector.extract_strided_slice %187 {offsets = [3, 0, 0], sizes = [1, 8, 8], strides = [1, 1, 1]} : vector<8x8x8xf32> to vector<1x8x8xf32>
    %195 = vector.shape_cast %194 : vector<1x8x8xf32> to vector<8x8xf32>
    %196 = tpu.concatenate %189, %191, %193, %195 in 1 : vector<8x8xf32>, vector<8x8xf32>, vector<8x8xf32>, vector<8x8xf32> -> vector<8x32xf32>
    %197 = vector.extract_strided_slice %187 {offsets = [4, 0, 0], sizes = [1, 8, 8], strides = [1, 1, 1]} : vector<8x8x8xf32> to vector<1x8x8xf32>
    %198 = vector.shape_cast %197 : vector<1x8x8xf32> to vector<8x8xf32>
    %199 = vector.extract_strided_slice %187 {offsets = [5, 0, 0], sizes = [1, 8, 8], strides = [1, 1, 1]} : vector<8x8x8xf32> to vector<1x8x8xf32>
    %200 = vector.shape_cast %199 : vector<1x8x8xf32> to vector<8x8xf32>
    %201 = vector.extract_strided_slice %187 {offsets = [6, 0, 0], sizes = [1, 8, 8], strides = [1, 1, 1]} : vector<8x8x8xf32> to vector<1x8x8xf32>
    %202 = vector.shape_cast %201 : vector<1x8x8xf32> to vector<8x8xf32>
    %203 = vector.extract_strided_slice %187 {offsets = [7, 0, 0], sizes = [1, 8, 8], strides = [1, 1, 1]} : vector<8x8x8xf32> to vector<1x8x8xf32>
    %204 = vector.shape_cast %203 : vector<1x8x8xf32> to vector<8x8xf32>
    %205 = tpu.concatenate %198, %200, %202, %204 in 1 : vector<8x8xf32>, vector<8x8xf32>, vector<8x8xf32>, vector<8x8xf32> -> vector<8x32xf32>
    %206 = tpu.concatenate %196, %205 in 0 : vector<8x32xf32>, vector<8x32xf32> -> vector<16x32xf32>
    %207 = arith.addf %123, %206 : vector<16x32xf32>
    %cst_45 = arith.constant dense<0.000000e+00> : vector<16xf32>
    %208 = vector.multi_reduction <add>, %207, %cst_45 [1] : vector<16x32xf32> to vector<16xf32>
    %209 = vector.shape_cast %208 : vector<16xf32> to vector<16x1xf32>
    %210 = arith.mulf %207, %207 : vector<16x32xf32>
    %cst_46 = arith.constant dense<0.000000e+00> : vector<16xf32>
    %211 = vector.multi_reduction <add>, %210, %cst_46 [1] : vector<16x32xf32> to vector<16xf32>
    %212 = vector.shape_cast %211 : vector<16xf32> to vector<16x1xf32>
    %cst_47 = arith.constant 3.125000e-02 : f32
    %213 = vector.broadcast %cst_47 : f32 to vector<16x1xf32>
    %214 = arith.mulf %209, %213 : vector<16x1xf32>
    %cst_48 = arith.constant 3.125000e-02 : f32
    %215 = vector.broadcast %cst_48 : f32 to vector<16x1xf32>
    %216 = arith.mulf %212, %215 : vector<16x1xf32>
    %217 = arith.mulf %214, %214 : vector<16x1xf32>
    %218 = arith.subf %216, %217 : vector<16x1xf32>
    %219 = vector.broadcast %214 : vector<16x1xf32> to vector<16x32xf32>
    %220 = arith.subf %207, %219 : vector<16x32xf32>
    %cst_49 = arith.constant 9.99999974E-6 : f32
    %221 = vector.broadcast %cst_49 : f32 to vector<16x1xf32>
    %222 = arith.addf %218, %221 : vector<16x1xf32>
    %223 = math.rsqrt %222 : vector<16x1xf32>
    %224 = vector.broadcast %223 : vector<16x1xf32> to vector<16x32xf32>
    %225 = arith.mulf %220, %224 : vector<16x32xf32>
    %226 = vector.broadcast %126 : vector<1x32xf32> to vector<16x32xf32>
    %227 = arith.mulf %225, %226 : vector<16x32xf32>
    %228 = vector.broadcast %127 : vector<1x32xf32> to vector<16x32xf32>
    %229 = arith.addf %227, %228 : vector<16x32xf32>
    %cst_50 = arith.constant dense<0.000000e+00> : vector<16x64xf32>
    %230 = tpu.matmul %229, %132, %cst_50 {dimension_numbers = #tpu.dot_dimension_numbers<[1], [0], [0], [1], [0, 0, 1, 1], [], []>} : vector<16x32xf32>, vector<32x64xf32>, vector<16x64xf32> -> vector<16x64xf32>
    %231 = vector.broadcast %128 : vector<1x64xf32> to vector<16x64xf32>
    %232 = arith.addf %230, %231 : vector<16x64xf32>
    %cst_51 = arith.constant 0.000000e+00 : f32
    %233 = vector.broadcast %cst_51 : f32 to vector<16x64xf32>
    %234 = arith.maximumf %232, %233 : vector<16x64xf32>
    %cst_52 = arith.constant dense<0.000000e+00> : vector<16x32xf32>
    %235 = tpu.matmul %234, %135, %cst_52 {dimension_numbers = #tpu.dot_dimension_numbers<[1], [0], [0], [1], [0, 0, 1, 1], [], []>} : vector<16x64xf32>, vector<64x32xf32>, vector<16x32xf32> -> vector<16x32xf32>
    %236 = vector.broadcast %129 : vector<1x32xf32> to vector<16x32xf32>
    %237 = arith.addf %235, %236 : vector<16x32xf32>
    %238 = arith.addf %229, %237 : vector<16x32xf32>
    %239 = vector.extract_strided_slice %5 {offsets = [12, 0], sizes = [1, 32], strides = [1, 1]} : vector<16x128xf32> to vector<1x32xf32>
    %240 = vector.extract_strided_slice %5 {offsets = [13, 0], sizes = [1, 32], strides = [1, 1]} : vector<16x128xf32> to vector<1x32xf32>
    %cst_53 = arith.constant dense<0.000000e+00> : vector<16xf32>
    %241 = vector.multi_reduction <add>, %238, %cst_53 [1] : vector<16x32xf32> to vector<16xf32>
    %242 = vector.shape_cast %241 : vector<16xf32> to vector<16x1xf32>
    %243 = arith.mulf %238, %238 : vector<16x32xf32>
    %cst_54 = arith.constant dense<0.000000e+00> : vector<16xf32>
    %244 = vector.multi_reduction <add>, %243, %cst_54 [1] : vector<16x32xf32> to vector<16xf32>
    %245 = vector.shape_cast %244 : vector<16xf32> to vector<16x1xf32>
    %cst_55 = arith.constant 3.125000e-02 : f32
    %246 = vector.broadcast %cst_55 : f32 to vector<16x1xf32>
    %247 = arith.mulf %242, %246 : vector<16x1xf32>
    %cst_56 = arith.constant 3.125000e-02 : f32
    %248 = vector.broadcast %cst_56 : f32 to vector<16x1xf32>
    %249 = arith.mulf %245, %248 : vector<16x1xf32>
    %250 = arith.mulf %247, %247 : vector<16x1xf32>
    %251 = arith.subf %249, %250 : vector<16x1xf32>
    %252 = vector.broadcast %247 : vector<16x1xf32> to vector<16x32xf32>
    %253 = arith.subf %238, %252 : vector<16x32xf32>
    %cst_57 = arith.constant 9.99999974E-6 : f32
    %254 = vector.broadcast %cst_57 : f32 to vector<16x1xf32>
    %255 = arith.addf %251, %254 : vector<16x1xf32>
    %256 = math.rsqrt %255 : vector<16x1xf32>
    %257 = vector.broadcast %256 : vector<16x1xf32> to vector<16x32xf32>
    %258 = arith.mulf %253, %257 : vector<16x32xf32>
    %259 = vector.broadcast %239 : vector<1x32xf32> to vector<16x32xf32>
    %260 = arith.mulf %258, %259 : vector<16x32xf32>
    %261 = vector.broadcast %240 : vector<1x32xf32> to vector<16x32xf32>
    %262 = arith.addf %260, %261 : vector<16x32xf32>
    %c0_58 = arith.constant 0 : index
    %c0_59 = arith.constant 0 : index
    %263 = vector.load %arg4[%c0_58, %c0_59] : memref<16x32xf32, #tpu.memory_space<vmem>>, vector<16x32xf32>
    tpu.vector_store %arg4[%c0_58, %c0_59], %262 {strides = array<i32>} : memref<16x32xf32, #tpu.memory_space<vmem>>, vector<16x32xf32>,
    return
  }
}

</mosaic_0001>

<bundles_post_ra>
// kernel: tpu_custom_call.1
= control target key start
LH: loop header
LB: loop body
LE: loop exit
PB: predicated region body
PF: predicated region fallthrough
CT: control target
= control target key end

     0   :  { %9 = vsyncpa [#allocation3], 0  ;;  %s4299_s0 = inlined_call_operand.vmem [shape: f32[16,1], index: 0, kind: input, shape index: {}]   ;;  %s4300_s1 = inlined_call_operand.hbm [shape: f32[2,16,32], index: 1, kind: input, shape index: {}]   ;;  %s4301_s2 = inlined_call_operand.vmem [shape: f32[16,128], index: 2, kind: input, shape index: {}]   ;;  %s4302_s3 = inlined_call_operand.hbm [shape: f32[4,64,64], index: 3, kind: input, shape index: {}]   ;;  %s4303_s4 = inlined_call_operand.hbm [shape: f32[16,32], index: 4, kind: output, shape index: {}]  }
   0x1   :  { %10 = vsyncpa [#allocation6], 0 }
   0x2   :  { %11 = vsyncpa [#allocation4], 0  ;;  %s3831_s15 = smov [#allocation2]  }
   0x3   :  { %s19_s16 = sshll.u32 %s3831_s15, 4  ;;  %s20_s16 = int_to_ptr.vmem [resolvable:$true] %s19_s16 }
   0x4   :  { %s3773_s17 = scalar_lea.vmem %s20_s16, 512  ;;  %p3778_p1 = scmp.lt.s32.totalorder %s20_s16, %s20_s16 }
   0x5   :  { %p3774_p0 = scmp.ne.s32.totalorder %s20_s16, %s3773_s17  ;;  %p3779_p2 = scmp.lt.s32.totalorder %s3773_s17, %s3773_s17 }
   0x7   :  { %p3780_p3 = por %p3779_p2, %p3778_p1 }
   0x9   :  { %p3781_p4 = pnand %p3780_p3, %p3774_p0 }
   0xb   :  { %3784 = shalt.err (!%p3781_p4)
}
   0xc   :  { %s3832_s18 = smov 128   ;;  %s3833_s19 = smov 8  }
   0xd   :  { %25 = dma.hbm_to_vmem [thread:$0]  %s4300_s1, 512, %s20_s16, [#allocation3], %s3832_s18, %s3832_s18, %s3833_s19  }
   0xe   :  { %s3834_s22 = smov [#allocation5]  }
   0xf   :  { %s33_s23 = sshll.u32 %s3834_s22, 4  ;;  %s34_s23 = int_to_ptr.vmem [resolvable:$true] %s33_s23 }
  0x10   :  { %s3793_s24 = scalar_lea.vmem %s34_s23, 4096  ;;  %p3798_p6 = scmp.lt.s32.totalorder %s34_s23, %s34_s23 }
  0x11   :  { %p3794_p5 = scmp.ne.s32.totalorder %s34_s23, %s3793_s24  ;;  %p3799_p7 = scmp.lt.s32.totalorder %s3793_s24, %s3793_s24 }
  0x13   :  { %p3800_p8 = por %p3799_p7, %p3798_p6 }
  0x15   :  { %p3801_p9 = pnand %p3800_p8, %p3794_p5 }
  0x17   :  { %3804 = shalt.err (!%p3801_p9)
}
  0x18   :  { %39 = dma.hbm_to_vmem [thread:$0]  %s4302_s3, 4096, %s34_s23, [#allocation6], %s3832_s18, %s3832_s18, %s3833_s19  }
  0x19   :  { %3825 = dma.done.wait [#allocation3], 512  }
  0x1a   :  { %3826 = vsyncadd [#allocation3], 4294966784 }
  0x1b   :  { %3827 = dma.done.wait [#allocation6], 4096  }
  0x1c   :  { %3828 = vsyncadd [#allocation6], 4294963200  ;;  %v3835_v0 = vmov 0   ;;  %v46_v1 = vld [vmem:[%s4299_s0] sm:$0xff]  ;;  %v47_v2 = vld [vmem:[%s4299_s0 + $0x8] sm:$0xff]  ;;  %vm82_vm0 = vcmask 261120   ;;  %v113_v33 = vlaneseq }
  0x1d   :  { %3680 = vset.pattern.permute.xlu0 %v3835_v0  ;;  %v48_v3 = vld [vmem:[#allocation2] sm:$0xff]  ;;  %v51_v4 = vld [vmem:[#allocation2 + $0x10] sm:$0xff]  ;;  %v49_v7 = vld [vmem:[#allocation2 + $0x8] sm:$0xff]  ;;  %v3836_v19 = vmov 0.0   ;;  %vm3837_vm1 = vmmov 0   ;;  %vm145_vm2 = vcmask 64512  }
  0x1e   :  { %57 = vperm.xlu0 %3680, %v46_v1   ;;  %v52_v9 = vld [vmem:[#allocation2 + $0x18] sm:$0xff]  ;;  %3447 = vmatprep.subr.mxu0 %v3836_v19  ;;  %v3907_v35 = vshrl.u32 %v113_v33, 7  ;;  %v3913_v37 = vld [vmem:[%s4301_s2] sm:$0xff]  ;;  %s3838_s30 = smov 120   ;;  %s3839_s5 = smov 112   ;;  %vm1415_vm3 = vcmask 130048  }
  0x1f   :  { %3462 = vmatprep.subr.mxu1 %v3836_v19  ;;  %3449 = vmatprep.mubr.msk.f32.mxu0 %vm3837_vm1, %v3836_v19  ;;  %s3840_s6 = smov 104   ;;  %s3841_s7 = smov 24   ;;  %vm1417_vm4 = vcmask 195584   ;;  %vm1569_vm5 = vcmask 523264  }
  0x20   :  { %3464 = vmatprep.mubr.msk.f32.mxu1 %vm3837_vm1, %v3836_v19  ;;  %v115_v36 = vsub.s32 0, %v3907_v35  ;;  %v121_v38 = vsub.s32 1, %v3907_v35  ;;  %s3842_s8 = smov 16  }
  0x22   :  { %62 = vperm.xlu0 %3680, %v47_v2   ;;  %v116_v40 = vrot.slane %v3913_v37, %v115_v36  ;;  %v122_v43 = vrot.slane %v3913_v37, %v121_v38 }
  0x99   :  { %v58_v5 = vpop.permute.xlu0 %57 }
  0x9a   :  { %v65_v6 = vmul.f32 %v58_v5, %v48_v3 }
  0x9c   :  { %v3887_v8 = vadd.f32 %v65_v6, %v51_v4 }
  0x9d   :  { %v63_v10 = vpop.permute.xlu0 %62 }
  0x9e   :  { %v66_v11 = vmul.f32 %v63_v10, %v49_v7  ;;  %v83_v12 = vsel %vm82_vm0, %v3887_v8, 0.0  ;;  %v89_v13 = vmul.f32 %v3887_v8, %v3887_v8 }
  0x9f   :  { %84 = vadd.xlane.f32.xlu1 %v83_v12 }
  0xa0   :  { %v3893_v14 = vadd.f32 %v66_v11, %v52_v9  ;;  %v91_v15 = vsel %vm82_vm0, %v89_v13, 0.0 }
  0xa2   :  { %v86_v16 = vsel %vm82_vm0, %v3893_v14, 0.0  ;;  %v90_v17 = vmul.f32 %v3893_v14, %v3893_v14 }
  0xa3   :  { %92 = vadd.xlane.f32.xlu1 %v91_v15  ;;  %87 = vadd.xlane.f32.xlu0 %v86_v16 }
  0xa4   :  { %v94_v18 = vsel %vm82_vm0, %v90_v17, 0.0 }
  0xa7   :  { %95 = vadd.xlane.f32.xlu1 %v94_v18 }
 0x128   :  { %v85_v20 = vpop.xlane.xlu1 %84 }
 0x129   :  { %v97_v21 = vmul.f32 0.03125, %v85_v20 }
 0x12b   :  { %v101_v24 = vmul.f32 %v97_v21, %v97_v21  ;;  %v105_v39 = vsub.f32 %v3887_v8, %v97_v21 }
 0x12c   :  { %v93_v22 = vpop.xlane.xlu1 %92  ;;  %v88_v23 = vpop.xlane.xlu0 %87 }
 0x12d   :  { %v99_v25 = vmul.f32 0.03125, %v93_v22  ;;  %v98_v26 = vmul.f32 0.03125, %v88_v23 }
 0x12f   :  { %v103_v27 = vsub.f32 %v99_v25, %v101_v24  ;;  %v102_v30 = vmul.f32 %v98_v26, %v98_v26  ;;  %v106_v44 = vsub.f32 %v3893_v14, %v98_v26 }
 0x130   :  { %v96_v28 = vpop.xlane.xlu1 %95 }
 0x131   :  { %v107_v29 = vadd.f32 1e-05, %v103_v27  ;;  %v100_v31 = vmul.f32 0.03125, %v96_v28 }
 0x133   :  { %3681 = vrsqrt.f32 %v107_v29  ;;  %v104_v32 = vsub.f32 %v100_v31, %v102_v30 }
 0x135   :  { %v108_v34 = vadd.f32 1e-05, %v104_v32 }
 0x137   :  { %3683 = vrsqrt.f32 %v108_v34 }
 0x140   :  { %v3682_v41 = vpop.eup %3681 }
 0x141   :  { %v111_v42 = vmul.f32 %v3682_v41, %v105_v39 }
 0x143   :  { %v117_v45 = vmul.f32 %v116_v40, %v111_v42 }
 0x144   :  { %v3684_v46 = vpop.eup %3683 }
 0x145   :  { %v112_v47 = vmul.f32 %v3684_v46, %v106_v44  ;;  %v123_v48 = vadd.f32 %v122_v43, %v117_v45 }
 0x147   :  { %3448 = vmatpush3.xpose.msk.msra.mxu0 %vm145_vm2, %v123_v48  ;;  %126 = vrot.lane.b32.xlu1 %v123_v48, %s3838_s30  ;;  %v118_v49 = vmul.f32 %v116_v40, %v112_v47 }
 0x148   :  { %3452 = vmatprep.subr.mxu0 %v3836_v19 }
 0x149   :  { %v3927_v50 = vadd.f32 %v122_v43, %v118_v49 }
 0x14a   :  { %3450 = vmatmul.mubr.msk.f32.vlgmr.msra.gmra.mxu0 %vm145_vm2, %v123_v48 }
 0x14b   :  { %129 = vrot.lane.b32.xlu1 %v123_v48, %s3839_s5  ;;  %139 = vrot.lane.b32.xlu0 %v3927_v50, %s3839_s5 }
 0x14c   :  { %3454 = vmatprep.mubr.msk.f32.mxu0 %vm3837_vm1, %v3836_v19 }
 0x14f   :  { %132 = vrot.lane.b32.xlu1 %v123_v48, %s3840_s6 }
 0x153   :  { %136 = vrot.lane.b32.xlu1 %v3927_v50, %s3838_s30 }
 0x157   :  { %142 = vrot.lane.b32.xlu1 %v3927_v50, %s3840_s6 }
 0x1b9   :  { %v127_v51 = vpop.permute.xlu1 %126 }
 0x1ba   :  { %3453 = vmatpush3.xpose.msk.msra.mxu0 %vm145_vm2, %v127_v51 }
 0x1bb   :  { %3457 = vmatprep.subr.mxu0 %v3836_v19 }
 0x1bd   :  { %3455 = vmatmul.mubr.msk.f32.vlgmr.msra.gmra.mxu0 %vm145_vm2, %v127_v51  ;;  %v3943_v52 = vpop.permute.xlu1 %129  ;;  %v3962_v54 = vpop.permute.xlu0 %139 }
 0x1be   :  { %3458 = vmatpush3.xpose.msk.msra.mxu0 %vm145_vm2, %v3943_v52  ;;  %3459 = vmatprep.mubr.msk.f32.mxu0 %vm3837_vm1, %v3836_v19 }
 0x1bf   :  { %3467 = vmatprep.subr.mxu0 %v3836_v19 }
 0x1c1   :  { %3460 = vmatmul.mubr.msk.f32.vlgmr.msra.gmra.mxu0 %vm145_vm2, %v3943_v52  ;;  %v3952_v53 = vpop.permute.xlu1 %132 }
 0x1c2   :  { %3463 = vmatpush3.xpose.msk.msra.mxu1 %vm145_vm2, %v3952_v53  ;;  %3468 = vmatpush3.xpose.msk.msra.mxu0 %vm145_vm2, %v3927_v50 }
 0x1c3   :  { %3469 = vmatprep.mubr.msk.f32.mxu0 %vm3837_vm1, %v3836_v19  ;;  %3472 = vmatprep.subr.mxu1 %v3836_v19 }
 0x1c4   :  { %3477 = vmatprep.subr.mxu0 %v3836_v19 }
 0x1c5   :  { %3465 = vmatmul.mubr.msk.f32.vlgmr.msra.gmra.mxu1 %vm145_vm2, %v3952_v53  ;;  %v3966_v55 = vpop.permute.xlu1 %136  ;;  %3470 = vmatmul.mubr.msk.f32.vlgmr.msra.gmra.mxu0 %vm145_vm2, %v3927_v50 }
 0x1c6   :  { %3473 = vmatpush3.xpose.msk.msra.mxu1 %vm145_vm2, %v3966_v55  ;;  %3478 = vmatpush3.xpose.msk.msra.mxu0 %vm145_vm2, %v3962_v54 }
 0x1c7   :  { %3474 = vmatprep.mubr.msk.f32.mxu1 %vm3837_vm1, %v3836_v19  ;;  %3479 = vmatprep.mubr.msk.f32.mxu0 %vm3837_vm1, %v3836_v19 }
 0x1c8   :  { %3482 = vmatprep.subr.mxu1 %v3836_v19  ;;  %3487 = vmatprep.subr.mxu0 %v3836_v19 }
 0x1c9   :  { %3475 = vmatmul.mubr.msk.f32.vlgmr.msra.gmra.mxu1 %vm145_vm2, %v3966_v55  ;;  %v3982_v56 = vpop.permute.xlu1 %142  ;;  %3480 = vmatmul.mubr.msk.f32.vlgmr.msra.gmra.mxu0 %vm145_vm2, %v3962_v54 }
 0x1ca   :  { %3483 = vmatpush3.xpose.msk.msra.mxu1 %vm145_vm2, %v3982_v56  ;;  %3488 = vmatpush3.msra.mxu0 %v123_v48 }
 0x1cb   :  { %3484 = vmatprep.mubr.msk.f32.mxu1 %vm3837_vm1, %v3836_v19  ;;  %3492 = vmatprep.subr.mxu1 %v3836_v19 }
 0x1cc   :  { %3489 = vmatprep.mubr.msk.f32.mxu0 %vm3837_vm1, %v3836_v19  ;;  %3497 = vmatprep.subr.mxu0 %v3836_v19 }
 0x1cd   :  { %3485 = vmatmul.mubr.msk.f32.vlgmr.msra.gmra.mxu1 %vm145_vm2, %v3982_v56 }
 0x1ce   :  { %3493 = vmatpush3.msra.mxu1 %v127_v51  ;;  %3494 = vmatprep.mubr.msk.f32.mxu1 %vm3837_vm1, %v3836_v19 }
 0x1cf   :  { %3502 = vmatprep.subr.mxu1 %v3836_v19 }
 0x20a   :  { %v214_v57 = vpop.f32.mrf.mxu0 }
 0x20b   :  { %v722_v58 = vmul.f32 0.35355338, %v214_v57 }
 0x20c   :  { %v3451_v59 = vpop.f32.mrf.mxu0 }
 0x20d   :  { %v730_v60 = vsel %vm145_vm2, %v722_v58, -inf }
 0x20e   :  { %731 = vmax.xlane.f32.xlu1 %v730_v60 }
 0x27d   :  { %v286_v61 = vpop.f32.mrf.mxu0 }
 0x27e   :  { %v723_v62 = vmul.f32 0.35355338, %v286_v61 }
 0x27f   :  { %v3456_v63 = vpop.f32.mrf.mxu0 }
 0x280   :  { %v733_v0 = vsel %vm145_vm2, %v723_v62, -inf }
 0x281   :  { %v358_v1 = vpop.f32.mrf.mxu0  ;;  %734 = vmax.xlane.f32.xlu0 %v733_v0 }
 0x282   :  { %v724_v9 = vmul.f32 0.35355338, %v358_v1 }
 0x283   :  { %v3461_v2 = vpop.f32.mrf.mxu0 }
 0x284   :  { %v736_v18 = vsel %vm145_vm2, %v724_v9, -inf }
 0x285   :  { %v430_v3 = vpop.f32.mrf.mxu1  ;;  %v502_v4 = vpop.f32.mrf.mxu0 }
 0x286   :  { %v725_v5 = vmul.f32 0.35355338, %v430_v3  ;;  %v726_v17 = vmul.f32 0.35355338, %v502_v4 }
 0x287   :  { %v3466_v6 = vpop.f32.mrf.mxu1  ;;  %v3471_v7 = vpop.f32.mrf.mxu0 }
 0x288   :  { %v739_v10 = vsel %vm145_vm2, %v725_v5, -inf  ;;  %v742_v26 = vsel %vm145_vm2, %v726_v17, -inf }
 0x289   :  { %740 = vmax.xlane.f32.xlu1 %v739_v10  ;;  %v574_v11 = vpop.f32.mrf.mxu1  ;;  %v646_v12 = vpop.f32.mrf.mxu0 }
 0x28a   :  { %v727_v13 = vmul.f32 0.35355338, %v574_v11  ;;  %v728_v24 = vmul.f32 0.35355338, %v646_v12 }
 0x28b   :  { %v3476_v15 = vpop.f32.mrf.mxu1  ;;  %v3481_v16 = vpop.f32.mrf.mxu0 }
 0x28c   :  { %v745_v20 = vsel %vm145_vm2, %v727_v13, -inf  ;;  %v748_v27 = vsel %vm145_vm2, %v728_v24, -inf }
 0x28d   :  { %737 = vmax.xlane.f32.xlu1 %v736_v18  ;;  %746 = vmax.xlane.f32.xlu0 %v745_v20  ;;  %v718_v21 = vpop.f32.mrf.mxu1 }
 0x28e   :  { %v729_v22 = vmul.f32 0.35355338, %v718_v21 }
 0x28f   :  { %v3486_v23 = vpop.f32.mrf.mxu1 }
 0x290   :  { %v751_v25 = vsel %vm145_vm2, %v729_v22, -inf }
 0x291   :  { %752 = vmax.xlane.f32.xlu0 %v751_v25  ;;  %743 = vmax.xlane.f32.xlu1 %v742_v26 }
 0x295   :  { %749 = vmax.xlane.f32.xlu1 %v748_v27 }
 0x297   :  { %v732_v28 = vpop.xlane.xlu1 %731 }
 0x298   :  { %v754_v29 = vsub.f32 %v722_v58, %v732_v28 }
 0x29a   :  { %v762_v30 = vmul.f32 1.442695, %v754_v29 }
 0x29c   :  { %3685 = vpow2.f32 %v762_v30 }
 0x2a9   :  { %v3686_v31 = vpop.eup %3685 }
 0x2aa   :  { %v778_v32 = vsel %vm145_vm2, %v3686_v31, 0.0 }
 0x2ab   :  { %779 = vadd.xlane.f32.xlu1 %v778_v32 }
 0x30a   :  { %v735_v33 = vpop.xlane.xlu0 %734 }
 0x30b   :  { %v755_v34 = vsub.f32 %v723_v62, %v735_v33 }
 0x30d   :  { %v764_v39 = vmul.f32 1.442695, %v755_v34 }
 0x30f   :  { %3687 = vpow2.f32 %v764_v39 }
 0x312   :  { %v741_v40 = vpop.xlane.xlu1 %740 }
 0x313   :  { %v757_v41 = vsub.f32 %v725_v5, %v741_v40 }
 0x315   :  { %v768_v42 = vmul.f32 1.442695, %v757_v41 }
 0x316   :  { %v747_v43 = vpop.xlane.xlu0 %746  ;;  %v738_v44 = vpop.xlane.xlu1 %737 }
 0x317   :  { %3689 = vpow2.f32 %v768_v42  ;;  %v759_v45 = vsub.f32 %v727_v13, %v747_v43  ;;  %v756_v46 = vsub.f32 %v724_v9, %v738_v44 }
 0x319   :  { %v772_v47 = vmul.f32 1.442695, %v759_v45  ;;  %v766_v48 = vmul.f32 1.442695, %v756_v46 }
 0x31a   :  { %v753_v49 = vpop.xlane.xlu0 %752  ;;  %v744_v51 = vpop.xlane.xlu1 %743 }
 0x31b   :  { %3691 = vpow2.f32 %v772_v47  ;;  %v761_v57 = vsub.f32 %v729_v22, %v753_v49  ;;  %v758_v58 = vsub.f32 %v726_v17, %v744_v51 }
 0x31c   :  { %v3688_v59 = vpop.eup %3687  ;;  %3693 = vpow2.f32 %v766_v48 }
 0x31d   :  { %v776_v60 = vmul.f32 1.442695, %v761_v57  ;;  %v770_v61 = vmul.f32 1.442695, %v758_v58  ;;  %v781_v62 = vsel %vm145_vm2, %v3688_v59, 0.0 }
 0x31e   :  { %782 = vadd.xlane.f32.xlu0 %v781_v62  ;;  %v750_v63 = vpop.xlane.xlu1 %749 }
 0x31f   :  { %3695 = vpow2.f32 %v776_v60  ;;  %v760_v0 = vsub.f32 %v728_v24, %v750_v63 }
 0x320   :  { %3697 = vpow2.f32 %v770_v61 }
 0x321   :  { %v774_v1 = vmul.f32 1.442695, %v760_v0 }
 0x323   :  { %3699 = vpow2.f32 %v774_v1 }
 0x324   :  { %v3690_v2 = vpop.eup %3689 }
 0x325   :  { %v787_v3 = vsel %vm145_vm2, %v3690_v2, 0.0 }
 0x326   :  { %788 = vadd.xlane.f32.xlu0 %v787_v3 }
 0x328   :  { %v3692_v4 = vpop.eup %3691 }
 0x329   :  { %v3694_v5 = vpop.eup %3693  ;;  %v793_v6 = vsel %vm145_vm2, %v3692_v4, 0.0 }
 0x32a   :  { %794 = vadd.xlane.f32.xlu0 %v793_v6  ;;  %v784_v7 = vsel %vm145_vm2, %v3694_v5, 0.0 }
 0x32b   :  { %785 = vadd.xlane.f32.xlu1 %v784_v7 }
 0x32c   :  { %v3696_v9 = vpop.eup %3695 }
 0x32d   :  { %v3698_v10 = vpop.eup %3697  ;;  %v799_v11 = vsel %vm145_vm2, %v3696_v9, 0.0 }
 0x32e   :  { %800 = vadd.xlane.f32.xlu0 %v799_v11  ;;  %v790_v12 = vsel %vm145_vm2, %v3698_v10, 0.0 }
 0x32f   :  { %791 = vadd.xlane.f32.xlu1 %v790_v12 }
 0x330   :  { %v3700_v13 = vpop.eup %3699 }
 0x331   :  { %v796_v15 = vsel %vm145_vm2, %v3700_v13, 0.0 }
 0x333   :  { %797 = vadd.xlane.f32.xlu1 %v796_v15 }
 0x334   :  { %v780_v16 = vpop.xlane.xlu1 %779 }
 0x335   :  { %3701 = vrcp.f32 %v780_v16 }
 0x342   :  { %v3702_v17 = vpop.eup %3701 }
 0x343   :  { %v803_v18 = vmul.f32 %v3702_v17, %v3686_v31 }
 0x345   :  { %3490 = vmatmul.mubr.msk.f32.vlgmr.msra.gmra.mxu0 %vm145_vm2, %v803_v18  ;;  %v72_v18 = vld [vmem:[#allocation5 + $0x18] sm:$0xff] }
 0x346   :  { %3498 = vmatpush3.msra.mxu0 %v3943_v52  ;;  %3499 = vmatprep.mubr.msk.f32.mxu0 %vm3837_vm1, %v3836_v19 }
 0x347   :  { %3507 = vmatprep.subr.mxu0 %v3836_v19 }
 0x3a7   :  { %v783_v20 = vpop.xlane.xlu0 %782 }
 0x3a8   :  { %3703 = vrcp.f32 %v783_v20  ;;  %v71_v20 = vld [vmem:[#allocation5 + $0x10] sm:$0xff] }
 0x3af   :  { %v789_v21 = vpop.xlane.xlu0 %788 }
 0x3b0   :  { %3705 = vrcp.f32 %v789_v21  ;;  %v70_v21 = vld [vmem:[#allocation5 + $0x8] sm:$0xff] }
 0x3b3   :  { %v795_v22 = vpop.xlane.xlu0 %794 }
 0x3b4   :  { %3707 = vrcp.f32 %v795_v22  ;;  %v786_v23 = vpop.xlane.xlu1 %785  ;;  %v69_v22 = vld [vmem:[#allocation5] sm:$0xff] }
 0x3b5   :  { %v3704_v24 = vpop.eup %3703  ;;  %3709 = vrcp.f32 %v786_v23  ;;  %v80_v23 = vld [vmem:[#allocation5 + $0x70] sm:$0xff] }
 0x3b6   :  { %v805_v25 = vmul.f32 %v3704_v24, %v3688_v59  ;;  %v79_v24 = vld [vmem:[#allocation5 + $0x68] sm:$0xff] }
 0x3b7   :  { %v801_v26 = vpop.xlane.xlu0 %800 }
 0x3b8   :  { %3711 = vrcp.f32 %v801_v26  ;;  %v792_v27 = vpop.xlane.xlu1 %791  ;;  %3495 = vmatmul.mubr.msk.f32.vlgmr.msra.gmra.mxu1 %vm145_vm2, %v805_v25  ;;  %v78_v25 = vld [vmem:[#allocation5 + $0x60] sm:$0xff] }
 0x3b9   :  { %3713 = vrcp.f32 %v792_v27  ;;  %3503 = vmatpush3.msra.mxu1 %v3952_v53  ;;  %3504 = vmatprep.mubr.msk.f32.mxu1 %vm3837_vm1, %v3836_v19 }
 0x3ba   :  { %3512 = vmatprep.subr.mxu1 %v3836_v19 }
 0x3bc   :  { %v798_v52 = vpop.xlane.xlu1 %797 }
 0x3bd   :  { %v3706_v28 = vpop.eup %3705  ;;  %3715 = vrcp.f32 %v798_v52 }
 0x3be   :  { %v809_v29 = vmul.f32 %v3706_v28, %v3690_v2 }
 0x3c0   :  { %3505 = vmatmul.mubr.msk.f32.vlgmr.msra.gmra.mxu1 %vm145_vm2, %v809_v29 }
 0x3c1   :  { %v3708_v30 = vpop.eup %3707  ;;  %3513 = vmatpush3.msra.mxu1 %v3966_v55  ;;  %3514 = vmatprep.mubr.msk.f32.mxu1 %vm3837_vm1, %v3836_v19 }
 0x3c2   :  { %v3710_v31 = vpop.eup %3709  ;;  %3522 = vmatprep.subr.mxu1 %v3836_v19  ;;  %v813_v53 = vmul.f32 %v3708_v30, %v3692_v4 }
 0x3c3   :  { %v807_v32 = vmul.f32 %v3710_v31, %v3694_v5 }
 0x3c4   :  { %3515 = vmatmul.mubr.msk.f32.vlgmr.msra.gmra.mxu1 %vm145_vm2, %v813_v53 }
 0x3c5   :  { %v3712_v33 = vpop.eup %3711  ;;  %3500 = vmatmul.mubr.msk.f32.vlgmr.msra.gmra.mxu0 %vm145_vm2, %v807_v32  ;;  %3523 = vmatpush3.msra.mxu1 %v3982_v56 }
 0x3c6   :  { %v3714_v34 = vpop.eup %3713  ;;  %3508 = vmatpush3.msra.mxu0 %v3927_v50  ;;  %3509 = vmatprep.mubr.msk.f32.mxu0 %vm3837_vm1, %v3836_v19  ;;  %v817_v55 = vmul.f32 %v3712_v33, %v3696_v9 }
 0x3c7   :  { %3517 = vmatprep.subr.mxu0 %v3836_v19  ;;  %3524 = vmatprep.mubr.msk.f32.mxu1 %vm3837_vm1, %v3836_v19  ;;  %v811_v39 = vmul.f32 %v3714_v34, %v3698_v10 }
 0x3c8   :  { %3525 = vmatmul.mubr.msk.f32.vlgmr.msra.gmra.mxu1 %vm145_vm2, %v817_v55 }
 0x3c9   :  { %3510 = vmatmul.mubr.msk.f32.vlgmr.msra.gmra.mxu0 %vm145_vm2, %v811_v39 }
 0x3ca   :  { %v3716_v40 = vpop.eup %3715  ;;  %3518 = vmatpush3.msra.mxu0 %v3962_v54  ;;  %3519 = vmatprep.mubr.msk.f32.mxu0 %vm3837_vm1, %v3836_v19 }
 0x3cb   :  { %v815_v50 = vmul.f32 %v3716_v40, %v3700_v13  ;;  %3527 = vmatprep.subr.mxu0 %v72_v18 }
 0x3cd   :  { %3520 = vmatmul.mubr.msk.f32.vlgmr.msra.gmra.mxu0 %vm145_vm2, %v815_v50  ;;  %v1468_v50 = vsub.s32 2, %v3907_v35 }
 0x3ce   :  { %3528 = vmatpush3.msra.mxu0 %v72_v18 }
 0x3cf   :  { %3529 = vmatprep.subr.mxu0 %v71_v20 }
 0x3d0   :  { %3530 = vmatpush3.msra.mxu0 %v71_v20 }
 0x3d1   :  { %3531 = vmatprep.subr.mxu0 %v70_v21 }
 0x3d2   :  { %3532 = vmatpush3.msra.mxu0 %v70_v21 }
 0x3d3   :  { %3533 = vmatprep.subr.mxu0 %v69_v22 }
 0x3d4   :  { %3534 = vmatpush3.msra.mxu0 %v69_v22 }
 0x3d5   :  { %3557 = vmatprep.subr.mxu0 %v3836_v19 }
 0x405   :  { %v887_v56 = vpop.f32.mrf.mxu0 }
 0x407   :  { %v3491_v41 = vpop.f32.mrf.mxu0 }
 0x478   :  { %v960_v42 = vpop.f32.mrf.mxu1 }
 0x479   :  { %1403 = vrot.lane.b32.xlu1 %v960_v42, %s3833_s19  ;;  %v1469_v42 = vrot.slane %v3913_v37, %v1468_v50 }
 0x47a   :  { %v3496_v43 = vpop.f32.mrf.mxu1 }
 0x480   :  { %v1106_v44 = vpop.f32.mrf.mxu1 }
 0x481   :  { %1411 = vrot.lane.b32.xlu1 %v1106_v44, %s3841_s7 }
 0x482   :  { %v3506_v45 = vpop.f32.mrf.mxu1 }
 0x484   :  { %v1252_v46 = vpop.f32.mrf.mxu1 }
 0x485   :  { %v1033_v47 = vpop.f32.mrf.mxu0  ;;  %1420 = vrot.lane.b32.xlu1 %v1252_v46, %s3833_s19 }
 0x486   :  { %1407 = vrot.lane.b32.xlu0 %v1033_v47, %s3842_s8  ;;  %v3516_v54 = vpop.f32.mrf.mxu1 }
 0x487   :  { %v3501_v48 = vpop.f32.mrf.mxu0 }
 0x488   :  { %v1398_v49 = vpop.f32.mrf.mxu1 }
 0x489   :  { %v1179_v51 = vpop.f32.mrf.mxu0  ;;  %1428 = vrot.lane.b32.xlu1 %v1398_v49, %s3841_s7 }
 0x48a   :  { %v3526_v57 = vpop.f32.mrf.mxu1 }
 0x48b   :  { %v3511_v58 = vpop.f32.mrf.mxu0 }
 0x48c   :  { %v77_v58 = vld [vmem:[#allocation5 + $0x58] sm:$0xff] }
 0x48d   :  { %v1325_v59 = vpop.f32.mrf.mxu0 }
 0x48e   :  { %1424 = vrot.lane.b32.xlu0 %v1325_v59, %s3842_s8  ;;  %v76_v59 = vld [vmem:[#allocation5 + $0x50] sm:$0xff] }
 0x48f   :  { %v3521_v60 = vpop.f32.mrf.mxu0 }
 0x490   :  { %v75_v60 = vld [vmem:[#allocation5 + $0x48] sm:$0xff] }
 0x4eb   :  { %v1404_v61 = vpop.permute.xlu1 %1403 }
 0x4ec   :  { %v1414_v63 = vsel %vm145_vm2, %v887_v56, %v1404_v61  ;;  %v1474_v56 = vsub.s32 3, %v3907_v35  ;;  %v74_v61 = vld [vmem:[#allocation5 + $0x40] sm:$0xff] }
 0x4ee   :  { %v1475_v45 = vrot.slane %v3913_v37, %v1474_v56 }
 0x4f3   :  { %v1412_v62 = vpop.permute.xlu1 %1411 }
 0x4f7   :  { %v1421_v3 = vpop.permute.xlu1 %1420 }
 0x4f8   :  { %v1408_v0 = vpop.permute.xlu0 %1407  ;;  %v1431_v7 = vsel %vm145_vm2, %v1179_v51, %v1421_v3 }
 0x4f9   :  { %v1416_v1 = vsel %vm1415_vm3, %v1414_v63, %v1408_v0 }
 0x4fa   :  { %v1418_v2 = vsel %vm1417_vm4, %v1416_v1, %v1412_v62  ;;  %v1480_v62 = vsub.s32 4, %v3907_v35 }
 0x4fb   :  { %v4055_v4 = vadd.f32 %v1418_v2, %v3887_v8  ;;  %v1429_v10 = vpop.permute.xlu1 %1428 }
 0x4fc   :  { %v1481_v63 = vrot.slane %v3913_v37, %v1480_v62 }
 0x4fd   :  { %v1436_v5 = vsel %vm82_vm0, %v4055_v4, 0.0  ;;  %v1442_v6 = vmul.f32 %v4055_v4, %v4055_v4 }
 0x4fe   :  { %1437 = vadd.xlane.f32.xlu0 %v1436_v5 }
 0x4ff   :  { %v1444_v12 = vsel %vm82_vm0, %v1442_v6, 0.0  ;;  %v1567_v6 = vsub.s32 5, %v3907_v35 }
 0x500   :  { %v1425_v9 = vpop.permute.xlu0 %1424 }
 0x501   :  { %v1432_v11 = vsel %vm1415_vm3, %v1431_v7, %v1425_v9  ;;  %v1568_v7 = vrot.slane %v3913_v37, %v1567_v6 }
 0x502   :  { %v1433_v13 = vsel %vm1417_vm4, %v1432_v11, %v1429_v10  ;;  %1445 = vadd.xlane.f32.xlu0 %v1444_v12 }
 0x503   :  { %v1435_v8 = vadd.f32 %v1433_v13, %v3893_v14  ;;  %v81_v14 = vld [vmem:[#allocation5 + $0x78] sm:$0xff] }
 0x504   :  { %3538 = vmatprep.subr.mxu1 %v81_v14 }
 0x505   :  { %v1439_v15 = vsel %vm82_vm0, %v1435_v8, 0.0  ;;  %v1443_v16 = vmul.f32 %v1435_v8, %v1435_v8  ;;  %3539 = vmatpush3.msra.mxu1 %v81_v14 }
 0x506   :  { %1440 = vadd.xlane.f32.xlu1 %v1439_v15  ;;  %3540 = vmatprep.subr.mxu1 %v80_v23 }
 0x507   :  { %v1447_v17 = vsel %vm82_vm0, %v1443_v16, 0.0  ;;  %3541 = vmatpush3.msra.mxu1 %v80_v23 }
 0x508   :  { %1448 = vadd.xlane.f32.xlu0 %v1447_v17  ;;  %3542 = vmatprep.subr.mxu1 %v79_v24 }
 0x509   :  { %3543 = vmatpush3.msra.mxu1 %v79_v24 }
 0x50a   :  { %3544 = vmatprep.subr.mxu1 %v78_v25 }
 0x50b   :  { %3545 = vmatpush3.msra.mxu1 %v78_v25 }
 0x50c   :  { %3546 = vmatprep.subr.mxu1 %v77_v58 }
 0x50d   :  { %3547 = vmatpush3.msra.mxu1 %v77_v58 }
 0x50e   :  { %3548 = vmatprep.subr.mxu1 %v76_v59 }
 0x50f   :  { %3549 = vmatpush3.msra.mxu1 %v76_v59 }
 0x510   :  { %3550 = vmatprep.subr.mxu1 %v75_v60 }
 0x511   :  { %3551 = vmatpush3.msra.mxu1 %v75_v60 }
 0x512   :  { %3552 = vmatprep.subr.mxu1 %v74_v61 }
 0x513   :  { %3553 = vmatpush3.msra.mxu1 %v74_v61 }
 0x514   :  { %3572 = vmatprep.subr.mxu1 %v3836_v19 }
 0x587   :  { %v1438_v26 = vpop.xlane.xlu0 %1437 }
 0x588   :  { %v1450_v27 = vmul.f32 0.03125, %v1438_v26 }
 0x58a   :  { %v1454_v28 = vmul.f32 %v1450_v27, %v1450_v27  ;;  %v1458_v41 = vsub.f32 %v4055_v4, %v1450_v27 }
 0x58b   :  { %v1446_v52 = vpop.xlane.xlu0 %1445 }
 0x58c   :  { %v1452_v29 = vmul.f32 0.03125, %v1446_v52 }
 0x58e   :  { %v1456_v30 = vsub.f32 %v1452_v29, %v1454_v28 }
 0x58f   :  { %v1441_v31 = vpop.xlane.xlu1 %1440 }
 0x590   :  { %v1460_v53 = vadd.f32 1e-05, %v1456_v30  ;;  %v1451_v32 = vmul.f32 0.03125, %v1441_v31 }
 0x591   :  { %v1449_v33 = vpop.xlane.xlu0 %1448 }
 0x592   :  { %3717 = vrsqrt.f32 %v1460_v53  ;;  %v1455_v34 = vmul.f32 %v1451_v32, %v1451_v32  ;;  %v1453_v55 = vmul.f32 0.03125, %v1449_v33  ;;  %v1459_v47 = vsub.f32 %v1435_v8, %v1451_v32 }
 0x593   :  { %v1699_v33 = vsub.s32 6, %v3907_v35 }
 0x594   :  { %v1457_v39 = vsub.f32 %v1453_v55, %v1455_v34  ;;  %v1705_v34 = vsub.s32 7, %v3907_v35 }
 0x596   :  { %v1461_v40 = vadd.f32 1e-05, %v1457_v39  ;;  %v1700_v39 = vrot.slane %v3913_v37, %v1699_v33 }
 0x598   :  { %3719 = vrsqrt.f32 %v1461_v40 }
 0x59f   :  { %v3718_v43 = vpop.eup %3717 }
 0x5a0   :  { %v1464_v44 = vmul.f32 %v3718_v43, %v1458_v41 }
 0x5a2   :  { %v1470_v46 = vmul.f32 %v1469_v42, %v1464_v44 }
 0x5a4   :  { %v1476_v54 = vadd.f32 %v1475_v45, %v1470_v46 }
 0x5a5   :  { %v3720_v48 = vpop.eup %3719 }
 0x5a6   :  { %v1465_v49 = vmul.f32 %v3720_v48, %v1459_v47  ;;  %3535 = vmatprep.mubr.msk.f32.mxu0 %vm82_vm0, %v1476_v54 }
 0x5a8   :  { %v1471_v51 = vmul.f32 %v1469_v42, %v1465_v49  ;;  %v1706_v42 = vrot.slane %v3913_v37, %v1705_v34 }
 0x5aa   :  { %v1477_v57 = vadd.f32 %v1475_v45, %v1471_v51 }
 0x5ac   :  { %3536 = vmatmul.mubr.msk.f32.vlgmr.msra.gmra.mxu0 %vm82_vm0, %v1477_v57 }
 0x5ad   :  { %3559 = vmatprep.mubr.msk.f32.mxu0 %vm3837_vm1, %v3836_v19 }
 0x66c   :  { %v3537_v0 = vpop.f32.mrf.mxu0 }
 0x66d   :  { %v1560_v1 = vadd.f32 %v3537_v0, %v1481_v63 }
 0x66e   :  { %v1554_v2 = vpop.f32.mrf.mxu0 }
 0x66f   :  { %v1555_v3 = vadd.f32 %v1554_v2, %v1481_v63  ;;  %v1564_v5 = vmax.f32 %v1560_v1, 0.0 }
 0x671   :  { %v1563_v4 = vmax.f32 %v1555_v3, 0.0 }
 0x673   :  { %3554 = vmatprep.mubr.msk.f32.mxu1 %vm1569_vm5, %v1563_v4 }
 0x674   :  { %3555 = vmatmul.mubr.msk.f32.vlgmr.msra.gmra.mxu1 %vm1569_vm5, %v1564_v5 }
 0x675   :  { %3574 = vmatprep.mubr.msk.f32.mxu1 %vm3837_vm1, %v3836_v19 }
 0x734   :  { %v3556_v9 = vpop.f32.mrf.mxu1 }
 0x735   :  { %v1648_v10 = vadd.f32 %v3556_v9, %v1568_v7 }
 0x736   :  { %v1642_v11 = vpop.f32.mrf.mxu1 }
 0x737   :  { %v1643_v12 = vadd.f32 %v1642_v11, %v1568_v7  ;;  %v4095_v13 = vadd.f32 %v1648_v10, %v1477_v57 }
 0x739   :  { %v4097_v8 = vadd.f32 %v1643_v12, %v1476_v54  ;;  %v1674_v18 = vmul.f32 %v4095_v13, %v4095_v13  ;;  %v1670_v20 = vsel %vm82_vm0, %v4095_v13, 0.0 }
 0x73b   :  { %v1667_v15 = vsel %vm82_vm0, %v4097_v8, 0.0  ;;  %v1673_v16 = vmul.f32 %v4097_v8, %v4097_v8  ;;  %v1678_v21 = vsel %vm82_vm0, %v1674_v18, 0.0 }
 0x73c   :  { %1668 = vadd.xlane.f32.xlu1 %v1667_v15 }
 0x73d   :  { %v1675_v17 = vsel %vm82_vm0, %v1673_v16, 0.0 }
 0x73e   :  { %1676 = vadd.xlane.f32.xlu0 %v1675_v17 }
 0x740   :  { %1671 = vadd.xlane.f32.xlu1 %v1670_v20 }
 0x742   :  { %1679 = vadd.xlane.f32.xlu0 %v1678_v21 }
 0x7c5   :  { %v1669_v22 = vpop.xlane.xlu1 %1668 }
 0x7c6   :  { %v1681_v14 = vmul.f32 0.03125, %v1669_v22 }
 0x7c7   :  { %v1677_v23 = vpop.xlane.xlu0 %1676 }
 0x7c8   :  { %v1685_v24 = vmul.f32 %v1681_v14, %v1681_v14  ;;  %v1683_v25 = vmul.f32 0.03125, %v1677_v23  ;;  %v1689_v55 = vsub.f32 %v4097_v8, %v1681_v14 }
 0x7c9   :  { %v1672_v26 = vpop.xlane.xlu1 %1671 }
 0x7ca   :  { %v1687_v27 = vsub.f32 %v1683_v25, %v1685_v24  ;;  %v1682_v52 = vmul.f32 0.03125, %v1672_v26 }
 0x7cb   :  { %v1680_v28 = vpop.xlane.xlu0 %1679 }
 0x7cc   :  { %v1691_v29 = vadd.f32 1e-05, %v1687_v27  ;;  %v1686_v30 = vmul.f32 %v1682_v52, %v1682_v52  ;;  %v1684_v31 = vmul.f32 0.03125, %v1680_v28  ;;  %v1690_v43 = vsub.f32 %v4095_v13, %v1682_v52 }
 0x7ce   :  { %3721 = vrsqrt.f32 %v1691_v29  ;;  %v1688_v53 = vsub.f32 %v1684_v31, %v1686_v30 }
 0x7d0   :  { %v1692_v32 = vadd.f32 1e-05, %v1688_v53 }
 0x7d2   :  { %3723 = vrsqrt.f32 %v1692_v32 }
 0x7db   :  { %v3722_v40 = vpop.eup %3721 }
 0x7dc   :  { %v1695_v41 = vmul.f32 %v3722_v40, %v1689_v55 }
 0x7de   :  { %v1701_v44 = vmul.f32 %v1700_v39, %v1695_v41 }
 0x7df   :  { %v3724_v45 = vpop.eup %3723 }
 0x7e0   :  { %v1696_v46 = vmul.f32 %v3724_v45, %v1690_v43  ;;  %v1707_v47 = vadd.f32 %v1706_v42, %v1701_v44 }
 0x7e2   :  { %1713 = vrot.lane.b32.xlu0 %v1707_v47, %s3839_s5  ;;  %1710 = vrot.lane.b32.xlu1 %v1707_v47, %s3838_s30  ;;  %v1702_v54 = vmul.f32 %v1700_v39, %v1696_v46 }
 0x7e3   :  { %3558 = vmatpush3.xpose.msk.msra.mxu0 %vm145_vm2, %v1707_v47 }
 0x7e4   :  { %v4118_v48 = vadd.f32 %v1706_v42, %v1702_v54  ;;  %3562 = vmatprep.subr.mxu0 %v3836_v19 }
 0x7e6   :  { %3560 = vmatmul.mubr.msk.f32.vlgmr.msra.gmra.mxu0 %vm145_vm2, %v1707_v47  ;;  %1716 = vrot.lane.b32.xlu1 %v1707_v47, %s3840_s6 }
 0x7e7   :  { %1723 = vrot.lane.b32.xlu0 %v4118_v48, %s3839_s5  ;;  %3564 = vmatprep.mubr.msk.f32.mxu0 %vm3837_vm1, %v3836_v19 }
 0x7ea   :  { %1720 = vrot.lane.b32.xlu1 %v4118_v48, %s3838_s30 }
 0x7ee   :  { %1726 = vrot.lane.b32.xlu1 %v4118_v48, %s3840_s6 }
 0x854   :  { %v1711_v37 = vpop.permute.xlu1 %1710  ;;  %v4133_v49 = vpop.permute.xlu0 %1713 }
 0x855   :  { %3563 = vmatpush3.xpose.msk.msra.mxu0 %vm145_vm2, %v1711_v37 }
 0x856   :  { %3567 = vmatprep.subr.mxu0 %v3836_v19 }
 0x858   :  { %3565 = vmatmul.mubr.msk.f32.vlgmr.msra.gmra.mxu0 %vm145_vm2, %v1711_v37  ;;  %v4136_v51 = vpop.permute.xlu1 %1716 }
 0x859   :  { %3568 = vmatpush3.xpose.msk.msra.mxu0 %vm145_vm2, %v4133_v49  ;;  %3573 = vmatpush3.xpose.msk.msra.mxu1 %vm145_vm2, %v4136_v51  ;;  %v4162_v58 = vpop.permute.xlu0 %1723 }
 0x85a   :  { %3569 = vmatprep.mubr.msk.f32.mxu0 %vm3837_vm1, %v3836_v19  ;;  %3577 = vmatprep.subr.mxu0 %v3836_v19 }
 0x85b   :  { %3582 = vmatprep.subr.mxu1 %v3836_v19 }
 0x85c   :  { %3570 = vmatmul.mubr.msk.f32.vlgmr.msra.gmra.mxu0 %vm145_vm2, %v4133_v49  ;;  %3575 = vmatmul.mubr.msk.f32.vlgmr.msra.gmra.mxu1 %vm145_vm2, %v4136_v51  ;;  %v4150_v57 = vpop.permute.xlu1 %1720 }
 0x85d   :  { %3578 = vmatpush3.xpose.msk.msra.mxu0 %vm145_vm2, %v4118_v48  ;;  %3583 = vmatpush3.xpose.msk.msra.mxu1 %vm145_vm2, %v4150_v57 }
 0x85e   :  { %3579 = vmatprep.mubr.msk.f32.mxu0 %vm3837_vm1, %v3836_v19  ;;  %3584 = vmatprep.mubr.msk.f32.mxu1 %vm3837_vm1, %v3836_v19 }
 0x85f   :  { %3587 = vmatprep.subr.mxu0 %v3836_v19  ;;  %3592 = vmatprep.subr.mxu1 %v3836_v19 }
 0x860   :  { %3580 = vmatmul.mubr.msk.f32.vlgmr.msra.gmra.mxu0 %vm145_vm2, %v4118_v48  ;;  %3585 = vmatmul.mubr.msk.f32.vlgmr.msra.gmra.mxu1 %vm145_vm2, %v4150_v57  ;;  %v4168_v59 = vpop.permute.xlu1 %1726 }
 0x861   :  { %3588 = vmatpush3.xpose.msk.msra.mxu0 %vm145_vm2, %v4162_v58  ;;  %3593 = vmatpush3.xpose.msk.msra.mxu1 %vm145_vm2, %v4168_v59 }
 0x862   :  { %3589 = vmatprep.mubr.msk.f32.mxu0 %vm3837_vm1, %v3836_v19  ;;  %3594 = vmatprep.mubr.msk.f32.mxu1 %vm3837_vm1, %v3836_v19 }
 0x863   :  { %3597 = vmatprep.subr.mxu0 %v3836_v19  ;;  %3602 = vmatprep.subr.mxu1 %v3836_v19 }
 0x864   :  { %3590 = vmatmul.mubr.msk.f32.vlgmr.msra.gmra.mxu0 %vm145_vm2, %v4162_v58  ;;  %3595 = vmatmul.mubr.msk.f32.vlgmr.msra.gmra.mxu1 %vm145_vm2, %v4168_v59 }
 0x865   :  { %3598 = vmatpush3.msra.mxu0 %v1707_v47  ;;  %3603 = vmatpush3.msra.mxu1 %v1711_v37 }
 0x866   :  { %3599 = vmatprep.mubr.msk.f32.mxu0 %vm3837_vm1, %v3836_v19  ;;  %3607 = vmatprep.subr.mxu0 %v3836_v19 }
 0x867   :  { %3604 = vmatprep.mubr.msk.f32.mxu1 %vm3837_vm1, %v3836_v19  ;;  %3612 = vmatprep.subr.mxu1 %v3836_v19 }
 0x8a6   :  { %v1797_v60 = vpop.f32.mrf.mxu0 }
 0x8a7   :  { %v2305_v61 = vmul.f32 0.35355338, %v1797_v60 }
 0x8a8   :  { %v3561_v63 = vpop.f32.mrf.mxu0 }
 0x8a9   :  { %v2313_v0 = vsel %vm145_vm2, %v2305_v61, -inf }
 0x8aa   :  { %2314 = vmax.xlane.f32.xlu0 %v2313_v0 }
 0x918   :  { %v1869_v1 = vpop.f32.mrf.mxu0 }
 0x919   :  { %v2306_v2 = vmul.f32 0.35355338, %v1869_v1 }
 0x91a   :  { %v3566_v3 = vpop.f32.mrf.mxu0 }
 0x91b   :  { %v2316_v4 = vsel %vm145_vm2, %v2306_v2, -inf }
 0x91c   :  { %2317 = vmax.xlane.f32.xlu1 %v2316_v4  ;;  %v1941_v5 = vpop.f32.mrf.mxu0  ;;  %v2013_v7 = vpop.f32.mrf.mxu1 }
 0x91d   :  { %v2307_v9 = vmul.f32 0.35355338, %v1941_v5  ;;  %v2308_v12 = vmul.f32 0.35355338, %v2013_v7 }
 0x91e   :  { %v3571_v10 = vpop.f32.mrf.mxu0  ;;  %v3576_v11 = vpop.f32.mrf.mxu1 }
 0x91f   :  { %v2319_v15 = vsel %vm145_vm2, %v2307_v9, -inf  ;;  %v2322_v23 = vsel %vm145_vm2, %v2308_v12, -inf }
 0x920   :  { %2320 = vmax.xlane.f32.xlu0 %v2319_v15  ;;  %v2085_v16 = vpop.f32.mrf.mxu0  ;;  %v2157_v17 = vpop.f32.mrf.mxu1 }
 0x921   :  { %v2309_v18 = vmul.f32 0.35355338, %v2085_v16  ;;  %v2310_v22 = vmul.f32 0.35355338, %v2157_v17 }
 0x922   :  { %v3581_v20 = vpop.f32.mrf.mxu0  ;;  %v3586_v21 = vpop.f32.mrf.mxu1 }
 0x923   :  { %v2325_v14 = vsel %vm145_vm2, %v2309_v18, -inf  ;;  %v2328_v30 = vsel %vm145_vm2, %v2310_v22, -inf }
 0x924   :  { %2326 = vmax.xlane.f32.xlu1 %v2325_v14  ;;  %v2229_v24 = vpop.f32.mrf.mxu0  ;;  %2323 = vmax.xlane.f32.xlu0 %v2322_v23  ;;  %v2301_v25 = vpop.f32.mrf.mxu1 }
 0x925   :  { %v2311_v26 = vmul.f32 0.35355338, %v2229_v24  ;;  %v2312_v28 = vmul.f32 0.35355338, %v2301_v25 }
 0x926   :  { %v3591_v27 = vpop.f32.mrf.mxu0  ;;  %v3596_v52 = vpop.f32.mrf.mxu1 }
 0x927   :  { %v2331_v29 = vsel %vm145_vm2, %v2311_v26, -inf  ;;  %v2334_v31 = vsel %vm145_vm2, %v2312_v28, -inf }
 0x928   :  { %2332 = vmax.xlane.f32.xlu1 %v2331_v29  ;;  %2329 = vmax.xlane.f32.xlu0 %v2328_v30 }
 0x92c   :  { %2335 = vmax.xlane.f32.xlu0 %v2334_v31 }
 0x933   :  { %v2315_v53 = vpop.xlane.xlu0 %2314 }
 0x934   :  { %v2337_v32 = vsub.f32 %v2305_v61, %v2315_v53 }
 0x936   :  { %v2345_v33 = vmul.f32 1.442695, %v2337_v32 }
 0x938   :  { %3725 = vpow2.f32 %v2345_v33 }
 0x945   :  { %v3726_v34 = vpop.eup %3725 }
 0x946   :  { %v2361_v55 = vsel %vm145_vm2, %v3726_v34, 0.0 }
 0x947   :  { %2362 = vadd.xlane.f32.xlu1 %v2361_v55 }
 0x9a5   :  { %v2318_v39 = vpop.xlane.xlu1 %2317 }
 0x9a6   :  { %v2338_v40 = vsub.f32 %v2306_v2, %v2318_v39 }
 0x9a8   :  { %v2347_v41 = vmul.f32 1.442695, %v2338_v40 }
 0x9a9   :  { %v2321_v42 = vpop.xlane.xlu0 %2320 }
 0x9aa   :  { %3727 = vpow2.f32 %v2347_v41  ;;  %v2339_v43 = vsub.f32 %v2307_v9, %v2321_v42 }
 0x9ac   :  { %v2349_v44 = vmul.f32 1.442695, %v2339_v43 }
 0x9ad   :  { %v2324_v45 = vpop.xlane.xlu0 %2323  ;;  %v2327_v46 = vpop.xlane.xlu1 %2326 }
 0x9ae   :  { %3729 = vpow2.f32 %v2349_v44  ;;  %v2340_v47 = vsub.f32 %v2308_v12, %v2324_v45  ;;  %v2341_v54 = vsub.f32 %v2309_v18, %v2327_v46 }
 0x9b0   :  { %v2351_v37 = vmul.f32 1.442695, %v2340_v47  ;;  %v2353_v60 = vmul.f32 1.442695, %v2341_v54 }
 0x9b1   :  { %v2330_v61 = vpop.xlane.xlu0 %2329  ;;  %v2333_v63 = vpop.xlane.xlu1 %2332 }
 0x9b2   :  { %3731 = vpow2.f32 %v2351_v37  ;;  %v2342_v0 = vsub.f32 %v2310_v22, %v2330_v61  ;;  %v2343_v1 = vsub.f32 %v2311_v26, %v2333_v63 }
 0x9b3   :  { %3733 = vpow2.f32 %v2353_v60 }
 0x9b4   :  { %v2355_v3 = vmul.f32 1.442695, %v2342_v0  ;;  %v2357_v2 = vmul.f32 1.442695, %v2343_v1 }
 0x9b5   :  { %v2336_v4 = vpop.xlane.xlu0 %2335 }
 0x9b6   :  { %3735 = vpow2.f32 %v2355_v3  ;;  %v2344_v5 = vsub.f32 %v2312_v28, %v2336_v4 }
 0x9b7   :  { %v3728_v7 = vpop.eup %3727  ;;  %3737 = vpow2.f32 %v2357_v2 }
 0x9b8   :  { %v2359_v9 = vmul.f32 1.442695, %v2344_v5  ;;  %v2364_v10 = vsel %vm145_vm2, %v3728_v7, 0.0 }
 0x9b9   :  { %2365 = vadd.xlane.f32.xlu0 %v2364_v10 }
 0x9ba   :  { %3739 = vpow2.f32 %v2359_v9 }
 0x9bb   :  { %v3730_v11 = vpop.eup %3729 }
 0x9bc   :  { %v2367_v12 = vsel %vm145_vm2, %v3730_v11, 0.0 }
 0x9bd   :  { %2368 = vadd.xlane.f32.xlu1 %v2367_v12 }
 0x9bf   :  { %v3732_v15 = vpop.eup %3731 }
 0x9c0   :  { %v3734_v16 = vpop.eup %3733  ;;  %v2370_v17 = vsel %vm145_vm2, %v3732_v15, 0.0 }
 0x9c1   :  { %2371 = vadd.xlane.f32.xlu0 %v2370_v17  ;;  %v2373_v18 = vsel %vm145_vm2, %v3734_v16, 0.0 }
 0x9c2   :  { %2374 = vadd.xlane.f32.xlu1 %v2373_v18 }
 0x9c3   :  { %v3736_v20 = vpop.eup %3735 }
 0x9c4   :  { %v3738_v21 = vpop.eup %3737  ;;  %v2376_v22 = vsel %vm145_vm2, %v3736_v20, 0.0 }
 0x9c5   :  { %2377 = vadd.xlane.f32.xlu0 %v2376_v22  ;;  %v2379_v14 = vsel %vm145_vm2, %v3738_v21, 0.0 }
 0x9c6   :  { %2380 = vadd.xlane.f32.xlu1 %v2379_v14 }
 0x9c7   :  { %v3740_v23 = vpop.eup %3739 }
 0x9c8   :  { %v2382_v24 = vsel %vm145_vm2, %v3740_v23, 0.0 }
 0x9c9   :  { %2383 = vadd.xlane.f32.xlu0 %v2382_v24 }
 0x9d0   :  { %v2363_v25 = vpop.xlane.xlu1 %2362 }
 0x9d1   :  { %3741 = vrcp.f32 %v2363_v25 }
 0x9de   :  { %v3742_v26 = vpop.eup %3741 }
 0x9df   :  { %v2386_v27 = vmul.f32 %v3742_v26, %v3726_v34 }
 0x9e1   :  { %3600 = vmatmul.mubr.msk.f32.vlgmr.msra.gmra.mxu0 %vm145_vm2, %v2386_v27 }
 0x9e2   :  { %3608 = vmatpush3.msra.mxu0 %v4133_v49  ;;  %3609 = vmatprep.mubr.msk.f32.mxu0 %vm3837_vm1, %v3836_v19 }
 0x9e3   :  { %3617 = vmatprep.subr.mxu0 %v3836_v19 }
 0xa42   :  { %v2366_v52 = vpop.xlane.xlu0 %2365 }
 0xa43   :  { %3743 = vrcp.f32 %v2366_v52 }
 0xa46   :  { %v2369_v28 = vpop.xlane.xlu1 %2368 }
 0xa47   :  { %3745 = vrcp.f32 %v2369_v28  ;;  %v1657_v28 = vld [vmem:[#allocation5 + $0x98] sm:$0xff] }
 0xa4a   :  { %v2372_v29 = vpop.xlane.xlu0 %2371 }
 0xa4b   :  { %3747 = vrcp.f32 %v2372_v29  ;;  %v2375_v30 = vpop.xlane.xlu1 %2374  ;;  %v1656_v29 = vld [vmem:[#allocation5 + $0x90] sm:$0xff] }
 0xa4c   :  { %3749 = vrcp.f32 %v2375_v30  ;;  %v1655_v30 = vld [vmem:[#allocation5 + $0x88] sm:$0xff] }
 0xa4e   :  { %v2378_v31 = vpop.xlane.xlu0 %2377 }
 0xa4f   :  { %3751 = vrcp.f32 %v2378_v31  ;;  %v2381_v53 = vpop.xlane.xlu1 %2380  ;;  %v1654_v31 = vld [vmem:[#allocation5 + $0x80] sm:$0xff] }
 0xa50   :  { %v3744_v32 = vpop.eup %3743  ;;  %3753 = vrcp.f32 %v2381_v53  ;;  %v1666_v53 = vld [vmem:[#allocation5 + $0xf8] sm:$0xff] }
 0xa51   :  { %v2388_v33 = vmul.f32 %v3744_v32, %v3728_v7  ;;  %v1664_v32 = vld [vmem:[#allocation5 + $0xe8] sm:$0xff] }
 0xa52   :  { %v2384_v49 = vpop.xlane.xlu0 %2383 }
 0xa53   :  { %3755 = vrcp.f32 %v2384_v49  ;;  %3605 = vmatmul.mubr.msk.f32.vlgmr.msra.gmra.mxu1 %vm145_vm2, %v2388_v33  ;;  %v1663_v33 = vld [vmem:[#allocation5 + $0xe0] sm:$0xff] }
 0xa54   :  { %v3746_v34 = vpop.eup %3745  ;;  %3613 = vmatpush3.msra.mxu1 %v4136_v51  ;;  %3614 = vmatprep.mubr.msk.f32.mxu1 %vm3837_vm1, %v3836_v19 }
 0xa55   :  { %v2390_v55 = vmul.f32 %v3746_v34, %v3730_v11  ;;  %3622 = vmatprep.subr.mxu1 %v3836_v19 }
 0xa57   :  { %3610 = vmatmul.mubr.msk.f32.vlgmr.msra.gmra.mxu0 %vm145_vm2, %v2390_v55 }
 0xa58   :  { %v3748_v39 = vpop.eup %3747  ;;  %3618 = vmatpush3.msra.mxu0 %v4118_v48  ;;  %3619 = vmatprep.mubr.msk.f32.mxu0 %vm3837_vm1, %v3836_v19 }
 0xa59   :  { %v3750_v40 = vpop.eup %3749  ;;  %3627 = vmatprep.subr.mxu0 %v3836_v19  ;;  %v2392_v41 = vmul.f32 %v3748_v39, %v3732_v15 }
 0xa5a   :  { %v2394_v42 = vmul.f32 %v3750_v40, %v3734_v16 }
 0xa5b   :  { %3615 = vmatmul.mubr.msk.f32.vlgmr.msra.gmra.mxu1 %vm145_vm2, %v2392_v41 }
 0xa5c   :  { %v3752_v51 = vpop.eup %3751  ;;  %3620 = vmatmul.mubr.msk.f32.vlgmr.msra.gmra.mxu0 %vm145_vm2, %v2394_v42  ;;  %3623 = vmatpush3.msra.mxu1 %v4150_v57 }
 0xa5d   :  { %v3754_v43 = vpop.eup %3753  ;;  %3628 = vmatpush3.msra.mxu0 %v4162_v58  ;;  %3624 = vmatprep.mubr.msk.f32.mxu1 %vm3837_vm1, %v3836_v19  ;;  %v2396_v48 = vmul.f32 %v3752_v51, %v3736_v20 }
 0xa5e   :  { %3629 = vmatprep.mubr.msk.f32.mxu0 %vm3837_vm1, %v3836_v19  ;;  %3632 = vmatprep.subr.mxu1 %v3836_v19  ;;  %v2398_v44 = vmul.f32 %v3754_v43, %v3738_v21 }
 0xa5f   :  { %3625 = vmatmul.mubr.msk.f32.vlgmr.msra.gmra.mxu1 %vm145_vm2, %v2396_v48  ;;  %3637 = vmatprep.subr.mxu0 %v1657_v28 }
 0xa60   :  { %v3756_v45 = vpop.eup %3755  ;;  %3630 = vmatmul.mubr.msk.f32.vlgmr.msra.gmra.mxu0 %vm145_vm2, %v2398_v44  ;;  %3633 = vmatpush3.msra.mxu1 %v4168_v59 }
 0xa61   :  { %3634 = vmatprep.mubr.msk.f32.mxu1 %vm3837_vm1, %v3836_v19  ;;  %v2400_v57 = vmul.f32 %v3756_v45, %v3740_v23  ;;  %3638 = vmatpush3.msra.mxu0 %v1657_v28 }
 0xa62   :  { %3639 = vmatprep.subr.mxu0 %v1656_v29  ;;  %3648 = vmatprep.subr.mxu1 %v1666_v53 }
 0xa63   :  { %3635 = vmatmul.mubr.msk.f32.vlgmr.msra.gmra.mxu1 %vm145_vm2, %v2400_v57  ;;  %3640 = vmatpush3.msra.mxu0 %v1656_v29 }
 0xa64   :  { %3641 = vmatprep.subr.mxu0 %v1655_v30  ;;  %3649 = vmatpush3.msra.mxu1 %v1666_v53 }
 0xa65   :  { %3642 = vmatpush3.msra.mxu0 %v1655_v30 }
 0xa66   :  { %3643 = vmatprep.subr.mxu0 %v1654_v31 }
 0xa67   :  { %3644 = vmatpush3.msra.mxu0 %v1654_v31 }
 0xaa1   :  { %v2470_v58 = vpop.f32.mrf.mxu0 }
 0xaa3   :  { %v3601_v46 = vpop.f32.mrf.mxu0 }
 0xaa4   :  { %v4262_v46 = vld [vmem:[%s4301_s2 + $0x8] sm:$0xff]  ;;  %s3843_s2 = smov [#allocation7]  }
 0xaa5   :  { %s3282_s11 = sshll.u32 %s3843_s2, 4  ;;  %s3283_s11 = int_to_ptr.vmem [resolvable:$true] %s3282_s11 }
 0xaa6   :  { %s3805_s12 = scalar_lea.vmem %s3283_s11, 256  ;;  %p3810_p11 = scmp.lt.s32.totalorder %s3283_s11, %s3283_s11 }
 0xaa7   :  { %p3806_p10 = scmp.ne.s32.totalorder %s3283_s11, %s3805_s12  ;;  %p3811_p12 = scmp.lt.s32.totalorder %s3805_s12, %s3805_s12 }
 0xaa9   :  { %p3812_p13 = por %p3811_p12, %p3810_p11 }
 0xaab   :  { %p3813_p0 = pnand %p3812_p13, %p3806_p10 }
 0xb13   :  { %v2543_v47 = vpop.f32.mrf.mxu1 }
 0xb14   :  { %2986 = vrot.lane.b32.xlu1 %v2543_v47, %s3833_s19 }
 0xb15   :  { %v3606_v54 = vpop.f32.mrf.mxu1 }
 0xb16   :  { %v3050_v54 = vrot.slane %v4262_v46, %v115_v36  ;;  %v1661_v36 = vld [vmem:[#allocation5 + $0xd0] sm:$0xff] }
 0xb17   :  { %v2616_v37 = vpop.f32.mrf.mxu0 }
 0xb18   :  { %2990 = vrot.lane.b32.xlu0 %v2616_v37, %s3842_s8 }
 0xb19   :  { %v3611_v60 = vpop.f32.mrf.mxu0 }
 0xb1b   :  { %v2689_v61 = vpop.f32.mrf.mxu1 }
 0xb1c   :  { %v2762_v63 = vpop.f32.mrf.mxu0  ;;  %2994 = vrot.lane.b32.xlu1 %v2689_v61, %s3841_s7  ;;  %v3056_v61 = vrot.slane %v4262_v46, %v121_v38  ;;  %v3062_v38 = vrot.slane %v4262_v46, %v1468_v50 }
 0xb1d   :  { %v3616_v59 = vpop.f32.mrf.mxu1 }
 0xb1e   :  { %v3621_v0 = vpop.f32.mrf.mxu0 }
 0xb1f   :  { %v2835_v19 = vpop.f32.mrf.mxu1 }
 0xb20   :  { %v2908_v1 = vpop.f32.mrf.mxu0  ;;  %3001 = vrot.lane.b32.xlu1 %v2835_v19, %s3833_s19 }
 0xb21   :  { %3005 = vrot.lane.b32.xlu0 %v2908_v1, %s3842_s8  ;;  %v3626_v3 = vpop.f32.mrf.mxu1 }
 0xb22   :  { %v3631_v2 = vpop.f32.mrf.mxu0 }
 0xb23   :  { %v2981_v4 = vpop.f32.mrf.mxu1 }
 0xb24   :  { %3009 = vrot.lane.b32.xlu1 %v2981_v4, %s3841_s7  ;;  %v1662_v4 = vld [vmem:[#allocation5 + $0xd8] sm:$0xff] }
 0xb25   :  { %v3636_v5 = vpop.f32.mrf.mxu1 }
 0xb26   :  { %v1660_v5 = vld [vmem:[#allocation5 + $0xc8] sm:$0xff] }
 0xb86   :  { %v2987_v7 = vpop.permute.xlu1 %2986 }
 0xb87   :  { %v2997_v10 = vsel %vm145_vm2, %v2470_v58, %v2987_v7  ;;  %v1659_v7 = vld [vmem:[#allocation5 + $0xc0] sm:$0xff] }
 0xb8a   :  { %v2991_v9 = vpop.permute.xlu0 %2990 }
 0xb8b   :  { %v2998_v11 = vsel %vm1415_vm3, %v2997_v10, %v2991_v9 }
 0xb8e   :  { %v2995_v12 = vpop.permute.xlu1 %2994 }
 0xb8f   :  { %v2999_v15 = vsel %vm1417_vm4, %v2998_v11, %v2995_v12 }
 0xb90   :  { %v4246_v16 = vadd.f32 %v2999_v15, %v4097_v8 }
 0xb92   :  { %v3002_v17 = vpop.permute.xlu1 %3001  ;;  %v3017_v18 = vsel %vm82_vm0, %v4246_v16, 0.0  ;;  %v3023_v20 = vmul.f32 %v4246_v16, %v4246_v16 }
 0xb93   :  { %v3006_v21 = vpop.permute.xlu0 %3005  ;;  %v3012_v22 = vsel %vm145_vm2, %v2762_v63, %v3002_v17  ;;  %3018 = vadd.xlane.f32.xlu0 %v3017_v18  ;;  %v3149_v17 = vrot.slane %v4262_v46, %v1474_v56 }
 0xb94   :  { %v3013_v14 = vsel %vm1415_vm3, %v3012_v22, %v3006_v21  ;;  %v3025_v24 = vsel %vm82_vm0, %v3023_v20, 0.0 }
 0xb96   :  { %v3010_v23 = vpop.permute.xlu1 %3009 }
 0xb97   :  { %v3014_v25 = vsel %vm1417_vm4, %v3013_v14, %v3010_v23  ;;  %3026 = vadd.xlane.f32.xlu0 %v3025_v24 }
 0xb98   :  { %v3016_v8 = vadd.f32 %v3014_v25, %v4095_v13  ;;  %v1665_v13 = vld [vmem:[#allocation5 + $0xf0] sm:$0xff] }
 0xb99   :  { %3650 = vmatprep.subr.mxu1 %v1665_v13 }
 0xb9a   :  { %v3020_v26 = vsel %vm82_vm0, %v3016_v8, 0.0  ;;  %v3024_v27 = vmul.f32 %v3016_v8, %v3016_v8  ;;  %3651 = vmatpush3.msra.mxu1 %v1665_v13 }
 0xb9b   :  { %3021 = vadd.xlane.f32.xlu1 %v3020_v26  ;;  %3652 = vmatprep.subr.mxu1 %v1664_v32 }
 0xb9c   :  { %v3028_v52 = vsel %vm82_vm0, %v3024_v27, 0.0  ;;  %3653 = vmatpush3.msra.mxu1 %v1664_v32 }
 0xb9d   :  { %3029 = vadd.xlane.f32.xlu0 %v3028_v52  ;;  %3654 = vmatprep.subr.mxu1 %v1663_v33 }
 0xb9e   :  { %3655 = vmatpush3.msra.mxu1 %v1663_v33 }
 0xb9f   :  { %3656 = vmatprep.subr.mxu1 %v1662_v4 }
 0xba0   :  { %3657 = vmatpush3.msra.mxu1 %v1662_v4 }
 0xba1   :  { %3658 = vmatprep.subr.mxu1 %v1661_v36 }
 0xba2   :  { %3659 = vmatpush3.msra.mxu1 %v1661_v36 }
 0xba3   :  { %3660 = vmatprep.subr.mxu1 %v1660_v5 }
 0xba4   :  { %3661 = vmatpush3.msra.mxu1 %v1660_v5 }
 0xba5   :  { %3662 = vmatprep.subr.mxu1 %v1659_v7 }
 0xba6   :  { %3663 = vmatpush3.msra.mxu1 %v1659_v7 }
 0xc1c   :  { %v3019_v49 = vpop.xlane.xlu0 %3018 }
 0xc1d   :  { %v3031_v34 = vmul.f32 0.03125, %v3019_v49 }
 0xc1f   :  { %v3035_v39 = vmul.f32 %v3031_v34, %v3031_v34  ;;  %v3039_v47 = vsub.f32 %v4246_v16, %v3031_v34 }
 0xc20   :  { %v3027_v55 = vpop.xlane.xlu0 %3026 }
 0xc21   :  { %v3033_v40 = vmul.f32 0.03125, %v3027_v55 }
 0xc23   :  { %v3037_v41 = vsub.f32 %v3033_v40, %v3035_v39  ;;  %v3266_v40 = vrot.slane %v4262_v46, %v1480_v62 }
 0xc24   :  { %v3022_v42 = vpop.xlane.xlu1 %3021 }
 0xc25   :  { %v3041_v51 = vadd.f32 1e-05, %v3037_v41  ;;  %v3032_v43 = vmul.f32 0.03125, %v3022_v42 }
 0xc26   :  { %v3030_v48 = vpop.xlane.xlu0 %3029 }
 0xc27   :  { %3757 = vrsqrt.f32 %v3041_v51  ;;  %v3036_v44 = vmul.f32 %v3032_v43, %v3032_v43  ;;  %v3034_v45 = vmul.f32 0.03125, %v3030_v48  ;;  %v3040_v59 = vsub.f32 %v3016_v8, %v3032_v43 }
 0xc28   :  { %v3272_v51 = vrot.slane %v4262_v46, %v1567_v6 }
 0xc29   :  { %v3038_v57 = vsub.f32 %v3034_v45, %v3036_v44 }
 0xc2b   :  { %v3042_v58 = vadd.f32 1e-05, %v3038_v57 }
 0xc2d   :  { %3759 = vrsqrt.f32 %v3042_v58 }
 0xc34   :  { %v3758_v37 = vpop.eup %3757 }
 0xc35   :  { %v3045_v60 = vmul.f32 %v3758_v37, %v3039_v47 }
 0xc37   :  { %v3051_v63 = vmul.f32 %v3050_v54, %v3045_v60 }
 0xc39   :  { %v3057_v0 = vadd.f32 %v3056_v61, %v3051_v63 }
 0xc3a   :  { %v3760_v19 = vpop.eup %3759 }
 0xc3b   :  { %v3046_v1 = vmul.f32 %v3760_v19, %v3040_v59  ;;  %3645 = vmatprep.mubr.msk.f32.mxu0 %vm82_vm0, %v3057_v0 }
 0xc3d   :  { %v3052_v3 = vmul.f32 %v3050_v54, %v3046_v1 }
 0xc3f   :  { %v3058_v2 = vadd.f32 %v3056_v61, %v3052_v3 }
 0xc41   :  { %3646 = vmatmul.mubr.msk.f32.vlgmr.msra.gmra.mxu0 %vm82_vm0, %v3058_v2 }
 0xd01   :  { %v3647_v9 = vpop.f32.mrf.mxu0 }
 0xd02   :  { %v3141_v10 = vadd.f32 %v3647_v9, %v3062_v38 }
 0xd03   :  { %v3135_v11 = vpop.f32.mrf.mxu0 }
 0xd04   :  { %v3136_v12 = vadd.f32 %v3135_v11, %v3062_v38  ;;  %v3145_v16 = vmax.f32 %v3141_v10, 0.0 }
 0xd06   :  { %v3144_v15 = vmax.f32 %v3136_v12, 0.0 }
 0xd08   :  { %3664 = vmatprep.mubr.msk.f32.mxu1 %vm1569_vm5, %v3144_v15 }
 0xd09   :  { %3665 = vmatmul.mubr.msk.f32.vlgmr.msra.gmra.mxu1 %vm1569_vm5, %v3145_v16 }
 0xdc9   :  { %v3666_v18 = vpop.f32.mrf.mxu1 }
 0xdca   :  { %v3228_v20 = vadd.f32 %v3666_v18, %v3149_v17 }
 0xdcb   :  { %v3222_v21 = vpop.f32.mrf.mxu1 }
 0xdcc   :  { %v3232_v22 = vadd.f32 %v3228_v20, %v3058_v2  ;;  %v3223_v14 = vadd.f32 %v3222_v21, %v3149_v17 }
 0xdce   :  { %v3231_v50 = vadd.f32 %v3223_v14, %v3057_v0  ;;  %v3236_v23 = vsel %vm82_vm0, %v3232_v22, 0.0  ;;  %v3240_v24 = vmul.f32 %v3232_v22, %v3232_v22 }
 0xdcf   :  { %3237 = vadd.xlane.f32.xlu0 %v3236_v23 }
 0xdd0   :  { %v3233_v25 = vsel %vm82_vm0, %v3231_v50, 0.0  ;;  %v3239_v8 = vmul.f32 %v3231_v50, %v3231_v50  ;;  %v3244_v26 = vsel %vm82_vm0, %v3240_v24, 0.0 }
 0xdd1   :  { %3234 = vadd.xlane.f32.xlu1 %v3233_v25 }
 0xdd2   :  { %v3241_v27 = vsel %vm82_vm0, %v3239_v8, 0.0 }
 0xdd3   :  { %3245 = vadd.xlane.f32.xlu0 %v3244_v26 }
 0xdd5   :  { %3242 = vadd.xlane.f32.xlu1 %v3241_v27 }
 0xe58   :  { %v3238_v56 = vpop.xlane.xlu0 %3237 }
 0xe59   :  { %v3248_v52 = vmul.f32 0.03125, %v3238_v56 }
 0xe5a   :  { %v3235_v28 = vpop.xlane.xlu1 %3234 }
 0xe5b   :  { %v3247_v29 = vmul.f32 0.03125, %v3235_v28  ;;  %v3252_v31 = vmul.f32 %v3248_v52, %v3248_v52  ;;  %v3256_v41 = vsub.f32 %v3232_v22, %v3248_v52 }
 0xe5c   :  { %v3246_v30 = vpop.xlane.xlu0 %3245 }
 0xe5d   :  { %v3250_v53 = vmul.f32 0.03125, %v3246_v30  ;;  %v3251_v32 = vmul.f32 %v3247_v29, %v3247_v29  ;;  %v3255_v43 = vsub.f32 %v3231_v50, %v3247_v29 }
 0xe5e   :  { %v3243_v13 = vpop.xlane.xlu1 %3242 }
 0xe5f   :  { %v3254_v33 = vsub.f32 %v3250_v53, %v3252_v31  ;;  %v3249_v49 = vmul.f32 0.03125, %v3243_v13 }
 0xe61   :  { %v3258_v34 = vadd.f32 1e-05, %v3254_v33  ;;  %v3253_v55 = vsub.f32 %v3249_v49, %v3251_v32 }
 0xe63   :  { %3761 = vrsqrt.f32 %v3258_v34  ;;  %v3257_v39 = vadd.f32 1e-05, %v3253_v55 }
 0xe65   :  { %3763 = vrsqrt.f32 %v3257_v39 }
 0xe70   :  { %v3762_v42 = vpop.eup %3761 }
 0xe71   :  { %v3262_v48 = vmul.f32 %v3762_v42, %v3256_v41 }
 0xe72   :  { %v3764_v44 = vpop.eup %3763 }
 0xe73   :  { %v3261_v45 = vmul.f32 %v3764_v44, %v3255_v43  ;;  %v3268_v57 = vmul.f32 %v3266_v40, %v3262_v48 }
 0xe75   :  { %v3267_v58 = vmul.f32 %v3266_v40, %v3261_v45  ;;  %v3274_v47 = vadd.f32 %v3272_v51, %v3268_v57 }
 0xe77   :  { %v3273_v54 = vadd.f32 %v3272_v51, %v3267_v58  ;;  %3276 = vst.msk [vmem:[#allocation7 + $0x8] sm:$0xff] %vm82_vm0, %v3274_v47 }
 0xe79   :  { %3275 = vst.msk [vmem:[#allocation7] sm:$0xff] %vm82_vm0, %v3273_v54 }
 0xe7a   :  { %3816 = shalt.err (!%p3813_p0)
}
 0xe7b   :  { %3288 = dma.vmem_to_hbm [thread:$0]  %s3283_s11, 256, %s4303_s4, [#allocation4], %s3832_s18, %s3832_s18, %s3833_s19  }
 0xe7c   :  { %3829 = dma.done.wait [#allocation4], 256  }
 0xe7d   :  { %3830 = vsyncadd [#allocation4], 4294967040 }
 0xe7e   :  { %3292 = vsyncpa [#allocation3], 1 }
 0xe7f   :  { %3293 = vsyncpa [#allocation6], 1 }
 0xe80   :  { %3294 = vsyncpa [#allocation4], 1 }

</bundles_post_ra>
